<compile_context>
chip_gen: v5e
topology: v5e:2x2
jax: 0.10.0
libtpu: 0.0.40
codegen_flags: <defaults>
</compile_context>

<pallas_src>
import jax
import jax.numpy as jnp
from jax.experimental import pallas as pl
from jax.experimental.pallas import tpu as pltpu


def _round_up(x, m):
    return ((x + m - 1) // m) * m


# --------------------------- generation-aware knobs ---------------------------

def _device_kind():
    try:
        return jax.devices()[0].device_kind.lower()
    except Exception:
        return ""


def _default_tm_target():
    kind = _device_kind()
    if "v5 lite" in kind or "v5e" in kind or "v5lite" in kind:
        return 128          # v5e: 4x128^2 MXU, 16 MiB scoped-VMEM default
    if "v6" in kind:
        return 512          # v6e: 128 MiB VMEM, bigger tiles -> closer to HBM roofline
    return 256              # v7x / default


def _vmem_capacity_bytes():
    try:
        info = pltpu.get_tpu_info()
        for attr in ("vmem_capacity_bytes", "vmem_size_bytes", "vmem_bytes"):
            v = getattr(info, attr, None)
            if v:
                return int(v)
    except Exception:
        pass
    kind = _device_kind()
    return (64 << 20) if "v7" in kind else (128 << 20)


# ------------------------------- Pallas kernel --------------------------------

def semseg_tokens_pallas(idx, lut, posbias, *, strategy="fused_bf16",
                         tm_target=None, buffered_lut=True,
                         out_dtype=jnp.float32):
    """Fused class-gather + patch-projection + pos-emb add.

    idx:     (B, N, PP)          int32   class id of each pixel of each patch
                                         (pixel order ph*P_W + pw)
    lut:     strategy == "pploop": (PP, C_pad, D_pad) bf16
             otherwise:            (PP*C, D_pad)      bf16
             lut[(p), c, :] = class_emb[c] @ proj_w[:, :, ph, pw].T  (zero-padded)
    posbias: (N, D_pad)          bf16/f32  pos_emb[token] + conv_bias (batch-invariant!)
    returns: (B, N_pad, D_pad)   out_dtype (caller slices off padding if any)
    """
    B, N, PP = idx.shape
    D_pad = lut.shape[-1]
    assert D_pad % 128 == 0, "LUT/posbias last dim must be padded to a multiple of 128"
    assert posbias.shape == (N, D_pad)

    if strategy == "pploop":
        assert lut.ndim == 3 and lut.shape[0] == PP
        C_pad = lut.shape[1]
        C = None
    else:
        assert lut.ndim == 2 and lut.shape[0] % PP == 0
        C = lut.shape[0] // PP
        C_pad = None

    # --- tiling ---------------------------------------------------------------
    if tm_target is None:
        tm_target = _default_tm_target()
    TM = tm_target if N >= tm_target else max(16, _round_up(N, 16))
    N_pad = _round_up(N, TM)

    if N_pad != N:
        idx = jnp.pad(idx, ((0, 0), (0, N_pad - N), (0, 0)))
        posbias = jnp.pad(posbias, ((0, N_pad - N), (0, 0)))
    idx_flat = idx.reshape(B * N_pad, PP)

    n_blocks = N_pad // TM
    grid = (n_blocks, B)          # batch innermost -> posbias block index is unchanged
                                  # across consecutive steps -> not re-DMA'd.

    # --- kernel bodies ----------------------------------------------------------
    if strategy == "pploop":
        # Lane-dense, relayout-free: PP small matmuls (TM, C_pad) x (C_pad, D_pad).
        def kernel(idx_ref, lut_ref, pb_ref, out_ref):
            cls = jax.lax.broadcasted_iota(jnp.int32, (TM, C_pad), 1)
            acc = pb_ref[...].astype(jnp.float32)
            for p in range(PP):                              # static unroll
                col = idx_ref[:, p:p + 1]                    # (TM, 1) int32
                oh = (col == cls).astype(jnp.bfloat16)       # (TM, C_pad) lane-dense
                acc = acc + jnp.dot(oh, lut_ref[p],
                                    preferred_element_type=jnp.float32)
            out_ref[...] = acc.astype(out_ref.dtype)
    elif strategy == "fused_bf16":
        # Single big MXU matmul; one-hot built directly in bf16 (no f32 intermediate).
        def kernel(idx_ref, lut_ref, pb_ref, out_ref):
            idx_t = idx_ref[...]                                           # (TM, PP)
            cls = jax.lax.broadcasted_iota(jnp.int32, (TM, PP, C), 2)
            oh = (idx_t[:, :, None] == cls).astype(jnp.bfloat16)           # (TM, PP, C)
            oh = oh.reshape(TM, PP * C)
            acc = jnp.dot(oh, lut_ref[...], preferred_element_type=jnp.float32)
            out_ref[...] = (acc + pb_ref[...].astype(jnp.float32)).astype(out_ref.dtype)
    else:  # "fused_f32": conservative fallback (known-good lowering path)
        def kernel(idx_ref, lut_ref, pb_ref, out_ref):
            idx_t = idx_ref[...]
            cls = jax.lax.broadcasted_iota(jnp.int32, (TM, PP, C), 2)
            oh = (idx_t[:, :, None] == cls).astype(jnp.float32)
            oh = oh.reshape(TM, PP * C).astype(jnp.bfloat16)
            acc = jnp.dot(oh, lut_ref[...], preferred_element_type=jnp.float32)
            out_ref[...] = (acc + pb_ref[...].astype(jnp.float32)).astype(out_ref.dtype)

    # --- BlockSpecs -------------------------------------------------------------
    idx_spec = pl.BlockSpec((TM, PP), lambda n, b: (b * n_blocks + n, 0))
    pb_spec = pl.BlockSpec((TM, D_pad), lambda n, b: (n, 0))          # batch-invariant
    out_spec = pl.BlockSpec((TM, D_pad), lambda n, b: (b * n_blocks + n, 0))

    lut_map = (lambda n, b: (0, 0, 0)) if lut.ndim == 3 else (lambda n, b: (0, 0))
    use_buffered = buffered_lut and hasattr(pl, "Buffered")
    if use_buffered:
        lut_spec = pl.BlockSpec(lut.shape, lut_map, pipeline_mode=pl.Buffered(1))
    else:
        lut_spec = pl.BlockSpec(lut.shape, lut_map)

    # --- VMEM budget (double-buffered streams + LUT + in-kernel intermediates) ---
    lut_bytes = lut.size * lut.dtype.itemsize
    idx_tile = TM * PP * 4
    pb_tile = TM * D_pad * posbias.dtype.itemsize
    out_tile = TM * D_pad * jnp.dtype(out_dtype).itemsize
    if strategy == "pploop":
        interm = TM * (C_pad * 12 + D_pad * 8)            # iota + oh + col bcast + acc
    else:
        factor = 8 if strategy == "fused_bf16" else 12    # iota + one-hot + reshape copy
        interm = TM * PP * C * factor + TM * D_pad * 8
    need = (2 * (idx_tile + pb_tile + out_tile)
            + (1 if use_buffered else 2) * lut_bytes
            + interm + (2 << 20))
    vmem_cap = _vmem_capacity_bytes()
    cap = min(int(0.6 * vmem_cap), 96 << 20)              # ~38 MiB on 64 MiB (v7x) parts
    vmem_limit = int(min(max(need, 16 << 20), cap))

    out = pl.pallas_call(
        kernel,
        out_shape=jax.ShapeDtypeStruct((B * N_pad, D_pad), out_dtype),
        grid=grid,
        in_specs=[idx_spec, lut_spec, pb_spec],
        out_specs=out_spec,
        compiler_params=pltpu.CompilerParams(
            dimension_semantics=("parallel", "arbitrary"),
            vmem_limit_bytes=vmem_limit),
    )(idx_flat, lut, posbias)

    return out.reshape(B, N_pad, D_pad)


# ------------------------------- Glue (JAX) -----------------------------------

def build_2d_sincos_posemb(h, w, embed_dim, temperature=10000.0):
    """Matches MIRAGE/MultiMAE build_2d_sincos_posemb. Returns (1, D, h, w) f32."""
    assert embed_dim % 4 == 0
    grid_w = jnp.arange(w, dtype=jnp.float32)
    grid_h = jnp.arange(h, dtype=jnp.float32)
    gw, gh = jnp.meshgrid(grid_w, grid_h, indexing="ij")          # (w, h) each
    pos_dim = embed_dim // 4
    omega = jnp.arange(pos_dim, dtype=jnp.float32) / pos_dim
    omega = 1.0 / (temperature ** omega)
    out_w = gw.flatten()[:, None] * omega[None, :]
    out_h = gh.flatten()[:, None] * omega[None, :]
    pe = jnp.concatenate(
        [jnp.sin(out_w), jnp.cos(out_w), jnp.sin(out_h), jnp.cos(out_h)], axis=1)
    pe = pe.reshape(h, w, embed_dim).transpose(2, 0, 1)[None]     # (1, D, h, w)
    return pe.astype(jnp.float32)


def bilinear_resize_nchw(x, out_h, out_w):
    """F.interpolate(..., mode='bilinear', align_corners=False) equivalent."""
    _, _, H, W = x.shape
    if (H, W) == (out_h, out_w):
        return x

    def coords(out_size, in_size):
        o = jnp.arange(out_size, dtype=jnp.float32)
        c = (o + 0.5) * (in_size / out_size) - 0.5
        c = jnp.clip(c, 0.0, in_size - 1)
        lo = jnp.floor(c).astype(jnp.int32)
        hi = jnp.minimum(lo + 1, in_size - 1)
        frac = c - lo.astype(jnp.float32)
        return lo, hi, frac

    hl, hh, hf = coords(out_h, H)
    wl, wh, wf = coords(out_w, W)
    top = (x[:, :, hl, :] * (1.0 - hf)[None, None, :, None]
           + x[:, :, hh, :] * hf[None, None, :, None])
    out = (top[:, :, :, wl] * (1.0 - wf)[None, None, None, :]
           + top[:, :, :, wh] * wf[None, None, None, :])
    return out


class SemSegInputAdapterPallas:
    """Functional re-implementation of SemSegInputAdapter (sincos pos-emb,
    interpolate_class_emb=False, emb_padding_idx=None)."""

    def __init__(self, num_classes, stride_level, patch_size_full, dim_tokens,
                 image_size, dim_class_emb, key, posbias_dtype=jnp.bfloat16):
        self.num_classes = num_classes
        self.stride_level = stride_level
        self.P_H = max(1, patch_size_full // stride_level)
        self.P_W = max(1, patch_size_full // stride_level)
        self.dim_tokens = dim_tokens
        self.dim_class_emb = dim_class_emb
        self.image_size = (image_size, image_size)
        self.posbias_dtype = posbias_dtype

        h_posemb = self.image_size[0] // (stride_level * self.P_H)
        w_posemb = self.image_size[1] // (stride_level * self.P_W)
        self.pos_emb = build_2d_sincos_posemb(h_posemb, w_posemb, dim_tokens)

        k1, k2, k3 = jax.random.split(key, 3)
        # nn.Embedding weight, trunc_normal_(std=0.02)
        self.class_emb_w = 0.02 * jax.random.truncated_normal(
            k1, -2.0, 2.0, (num_classes, dim_class_emb), jnp.float32)
        # nn.Conv2d(dim_class_emb, dim_tokens, kernel=(P_H,P_W), stride=(P_H,P_W))
        fan_in = dim_class_emb * self.P_H * self.P_W
        bound = 1.0 / jnp.sqrt(fan_in)
        self.proj_w = jax.random.uniform(
            k2, (dim_tokens, dim_class_emb, self.P_H, self.P_W),
            jnp.float32, -bound, bound)
        self.proj_b = jax.random.uniform(
            k3, (dim_tokens,), jnp.float32, -bound, bound)

        # Precompute fused LUT(s) once (kept out of the per-call hot path).
        self._prepare_luts()
        self._posbias_cache = {}
        self._working_cfg = None

    # ---- precomputed constants ------------------------------------------------

    def _prepare_luts(self):
        C, D = self.num_classes, self.dim_tokens
        PH, PW = self.P_H, self.P_W
        PP = PH * PW
        D_pad = _round_up(D, 128)
        # lut[ph, pw, c, d] = sum_e class_emb[c, e] * proj_w[d, e, ph, pw]
        core = jnp.einsum('ce,dehw->hwcd', self.class_emb_w, self.proj_w)  # (PH,PW,C,D)

        lut2 = core.reshape(PP * C, D)
        if D_pad != D:
            lut2 = jnp.pad(lut2, ((0, 0), (0, D_pad - D)))
        self.lut_fused = lut2.astype(jnp.bfloat16)               # (PP*C, D_pad)

        self.lut_pploop = None
        if C >= 64:                                               # lane-dense path worth it
            C_pad = _round_up(C, 128)
            lut3 = core.reshape(PP, C, D)
            lut3 = jnp.pad(lut3, ((0, 0), (0, C_pad - C), (0, D_pad - D)))
            self.lut_pploop = lut3.astype(jnp.bfloat16)           # (PP, C_pad, D_pad)
        self.D_pad = D_pad

    def _get_posbias(self, N_H, N_W):
        k = (N_H, N_W)
        if k not in self._posbias_cache:
            D, D_pad = self.dim_tokens, self.D_pad
            pos = bilinear_resize_nchw(self.pos_emb, N_H, N_W)    # (1, D, N_H, N_W)
            pos = pos.reshape(D, N_H * N_W).T                     # (N, D)
            pb = pos + self.proj_b[None, :]
            if D_pad != D:
                pb = jnp.pad(pb, ((0, 0), (0, D_pad - D)))
            self._posbias_cache[k] = pb.astype(self.posbias_dtype)
        return self._posbias_cache[k]

    def _attempt_configs(self):
        if self._working_cfg is not None:
            return [self._working_cfg]
        if self.lut_pploop is not None:
            cfgs = [("pploop", True), ("pploop", False)]
        else:
            cfgs = [("fused_bf16", True), ("fused_bf16", False)]
        cfgs.append(("fused_f32", False))                         # known-good fallback
        return cfgs

    # ---- kernel-facing forward --------------------------------------------------

    def forward(self, x):
        """x: (B, H, W) int32 class map -> (B, N_H*N_W, dim_tokens) f32."""
        B, H, W = x.shape
        PH, PW = self.P_H, self.P_W
        D, D_pad = self.dim_tokens, self.D_pad
        assert H % PH == 0 and W % PW == 0
        N_H, N_W = H // PH, W // PW
        N, PP = N_H * N_W, PH * PW

        # int32 class map in per-patch pixel layout: (B, N, P_H*P_W), col = ph*P_W + pw
        idx = (x.astype(jnp.int32)
                .reshape(B, N_H, PH, N_W, PW)
                .transpose(0, 1, 3, 2, 4)
                .reshape(B, N, PP))

        posbias = self._get_posbias(N_H, N_W)                     # (N, D_pad) bf16

        out = None
        last_err = None
        for strat, buffered in self._attempt_configs():
            lut = self.lut_pploop if strat == "pploop" else self.lut_fused
            try:
                out = semseg_tokens_pallas(idx, lut, posbias, strategy=strat,
                                           buffered_lut=buffered)
                # Surface lowering/compile errors inside the try so the fallback
                # ladder can engage (eager path; under jit this is a no-op).
                jax.block_until_ready(out)
                self._working_cfg = (strat, buffered)
                break
            except Exception as e:                                # pragma: no cover
                last_err = e
                out = None
        if out is None:
            raise last_err

        # Avoid the slice entirely when no padding occurred.
        if out.shape[1] != N or out.shape[2] != D:
            out = out[:, :N, :D]
        return out

    # ---- plain-JAX reference -----------------------------------------------------

    def forward_ref(self, x):
        B, H, W = x.shape
        PH, PW = self.P_H, self.P_W
        D = self.dim_tokens
        N_H, N_W = H // PH, W // PW
        emb = self.class_emb_w[x].transpose(0, 3, 1, 2)           # (B, E, H, W)
        conv = jax.lax.conv_general_dilated(
            emb, self.proj_w, window_strides=(PH, PW), padding="VALID",
            dimension_numbers=("NCHW", "OIHW", "NCHW"))
        conv = conv + self.proj_b[None, :, None, None]
        x_patch = conv.reshape(B, D, N_H * N_W).transpose(0, 2, 1)
        pos = bilinear_resize_nchw(self.pos_emb, N_H, N_W)
        pos = pos.reshape(1, D, N_H * N_W).transpose(0, 2, 1)
        return x_patch + pos


# ----------------------------------- main --------------------------------------

if __name__ == "__main__":
    key = jax.random.PRNGKey(0)
    k_param, k_x, k_param2, k_x2 = jax.random.split(key, 4)

    # --- main demo (small shapes): small-C fused path ---------------------------
    num_classes, stride_level, patch_size_full = 4, 1, 4
    dim_tokens, image_size, dim_class_emb, B = 32, 16, 16, 2

    adapter = SemSegInputAdapterPallas(
        num_classes=num_classes, stride_level=stride_level,
        patch_size_full=patch_size_full, dim_tokens=dim_tokens,
        image_size=image_size, dim_class_emb=dim_class_emb, key=k_param)

    x = jax.random.randint(k_x, (B, image_size, image_size), 0, num_classes,
                           dtype=jnp.int32)

    out = jax.block_until_ready(adapter.forward(x))
    ref = jax.block_until_ready(adapter.forward_ref(x))
    assert out.shape == (B, (image_size // patch_size_full) ** 2, dim_tokens)
    # bf16 LUT + bf16 posbias streams with f32 accumulation: absolute error is bounded
    # by ~eps_bf16 * |pos_emb| ~ 2e-3; tolerance leaves margin over that.
    assert jnp.allclose(out, ref, atol=8e-3, rtol=8e-3), \
        "mismatch vs reference (small-C fused path)"

    # --- second smoke test: large-C (>=64) lane-dense PP-loop path ---------------
    adapter2 = SemSegInputAdapterPallas(
        num_classes=96, stride_level=1, patch_size_full=4, dim_tokens=32,
        image_size=16, dim_class_emb=16, key=k_param2)
    x2 = jax.random.randint(k_x2, (1, 16, 16), 0, 96, dtype=jnp.int32)
    out2 = jax.block_until_ready(adapter2.forward(x2))
    ref2 = jax.block_until_ready(adapter2.forward_ref(x2))
    assert jnp.allclose(out2, ref2, atol=8e-3, rtol=8e-3), \
        "mismatch vs reference (large-C PP-loop path)"

    print("KERNEL_OK")
</pallas_src>

<mosaic_0001>
module attributes {stable_mosaic.version = 11 : i64} {
  func.func @kernel(%arg0: i32, %arg1: i32, %arg2: memref<16x16xi32, #tpu.memory_space<vmem>>, %arg3: memref<64x128xbf16, #tpu.memory_space<vmem>>, %arg4: memref<16x128xbf16, #tpu.memory_space<vmem>>, %arg5: memref<16x128xf32, #tpu.memory_space<vmem>>) attributes {dimension_semantics = [#tpu.dimension_semantics<parallel>, #tpu.dimension_semantics<arbitrary>], iteration_bounds = array<i64: 1, 2>, scalar_prefetch = 0 : i64, scratch_operands = 0 : i64, tpu.core_type = #tpu.core_type<tc>, window_params = [{transform_indices = @transform_0, window_bounds = array<i64: 16, 16>}, {pipeline_mode = #tpu.pipeline_mode<synchronous>, transform_indices = @transform_1, window_bounds = array<i64: 64, 128>}, {transform_indices = @transform_2, window_bounds = array<i64: 16, 128>}, {transform_indices = @transform_3, window_bounds = array<i64: 16, 128>}]} {
    %c0 = arith.constant 0 : index
    %c0_0 = arith.constant 0 : index
    %0 = vector.load %arg2[%c0, %c0_0] : memref<16x16xi32, #tpu.memory_space<vmem>>, vector<16x16xi32>
    %1 = tpu.iota {dimensions = array<i32: 2>} : vector<16x16x4xi32>
    %2 = vector.shape_cast %0 : vector<16x16xi32> to vector<16x16x1xi32>
    %3 = vector.broadcast %2 : vector<16x16x1xi32> to vector<16x16x4xi32>
    %4 = arith.cmpi eq, %3, %1 : vector<16x16x4xi32>
    %5 = arith.extui %4 : vector<16x16x4xi1> to vector<16x16x4xi32>
    %6 = arith.sitofp %5 : vector<16x16x4xi32> to vector<16x16x4xf32>
    %7 = arith.truncf %6 : vector<16x16x4xf32> to vector<16x16x4xbf16>
    %8 = vector.shape_cast %7 : vector<16x16x4xbf16> to vector<16x64xbf16>
    %c0_1 = arith.constant 0 : index
    %c0_2 = arith.constant 0 : index
    %9 = vector.load %arg3[%c0_1, %c0_2] : memref<64x128xbf16, #tpu.memory_space<vmem>>, vector<64x128xbf16>
    %cst = arith.constant dense<0.000000e+00> : vector<16x128xf32>
    %10 = tpu.matmul %8, %9, %cst {dimension_numbers = #tpu.dot_dimension_numbers<[1], [0], [0], [1], [0, 0, 1, 1], [], []>} : vector<16x64xbf16>, vector<64x128xbf16>, vector<16x128xf32> -> vector<16x128xf32>
    %c0_3 = arith.constant 0 : index
    %c0_4 = arith.constant 0 : index
    %11 = vector.load %arg4[%c0_3, %c0_4] : memref<16x128xbf16, #tpu.memory_space<vmem>>, vector<16x128xbf16>
    %12 = arith.extf %11 : vector<16x128xbf16> to vector<16x128xf32>
    %13 = arith.addf %10, %12 : vector<16x128xf32>
    %c0_5 = arith.constant 0 : index
    %c0_6 = arith.constant 0 : index
    %14 = vector.load %arg5[%c0_5, %c0_6] : memref<16x128xf32, #tpu.memory_space<vmem>>, vector<16x128xf32>
    tpu.vector_store %arg5[%c0_5, %c0_6], %13 {strides = array<i32>} : memref<16x128xf32, #tpu.memory_space<vmem>>, vector<16x128xf32>,
    return
  }
  func.func @transform_0(%arg0: i32, %arg1: i32) -> (i32, i32) {
    %c1_i32 = arith.constant 1 : i32
    %0 = arith.muli %arg1, %c1_i32 : i32
    %1 = arith.addi %0, %arg0 : i32
    %c0_i32 = arith.constant 0 : i32
    %c0_i32_0 = arith.constant 0 : i32
    return %1, %c0_i32 : i32, i32
  }
  func.func @transform_1(%arg0: i32, %arg1: i32) -> (i32, i32) {
    %c0_i32 = arith.constant 0 : i32
    %c0_i32_0 = arith.constant 0 : i32
    %c0_i32_1 = arith.constant 0 : i32
    return %c0_i32, %c0_i32_0 : i32, i32
  }
  func.func @transform_2(%arg0: i32, %arg1: i32) -> (i32, i32) {
    %c0_i32 = arith.constant 0 : i32
    %c0_i32_0 = arith.constant 0 : i32
    return %arg0, %c0_i32 : i32, i32
  }
  func.func @transform_3(%arg0: i32, %arg1: i32) -> (i32, i32) {
    %c1_i32 = arith.constant 1 : i32
    %0 = arith.muli %arg1, %c1_i32 : i32
    %1 = arith.addi %0, %arg0 : i32
    %c0_i32 = arith.constant 0 : i32
    %c0_i32_0 = arith.constant 0 : i32
    return %1, %c0_i32 : i32, i32
  }
}

module attributes {stable_mosaic.version = 11 : i64} {
  func.func @kernel(%arg0: i32, %arg1: i32, %arg2: memref<16x16xi32, #tpu.memory_space<vmem>>, %arg3: memref<64x128xbf16, #tpu.memory_space<vmem>>, %arg4: memref<16x128xbf16, #tpu.memory_space<vmem>>, %arg5: memref<16x128xf32, #tpu.memory_space<vmem>>) attributes {dimension_semantics = [#tpu.dimension_semantics<parallel>, #tpu.dimension_semantics<arbitrary>], iteration_bounds = array<i64: 1, 2>, scalar_prefetch = 0 : i64, scratch_operands = 0 : i64, tpu.core_type = #tpu.core_type<tc>, window_params = [{transform_indices = @transform_0, window_bounds = array<i64: 16, 16>}, {pipeline_mode = #tpu.pipeline_mode<synchronous>, transform_indices = @transform_1, window_bounds = array<i64: 64, 128>}, {transform_indices = @transform_2, window_bounds = array<i64: 16, 128>}, {transform_indices = @transform_3, window_bounds = array<i64: 16, 128>}]} {
    %c0 = arith.constant 0 : index
    %c0_0 = arith.constant 0 : index
    %0 = vector.load %arg2[%c0, %c0_0] : memref<16x16xi32, #tpu.memory_space<vmem>>, vector<16x16xi32>
    %1 = tpu.iota {dimensions = array<i32: 2>} : vector<16x16x4xi32>
    %2 = vector.shape_cast %0 : vector<16x16xi32> to vector<16x16x1xi32>
    %3 = vector.broadcast %2 : vector<16x16x1xi32> to vector<16x16x4xi32>
    %4 = arith.cmpi eq, %3, %1 : vector<16x16x4xi32>
    %5 = arith.extui %4 : vector<16x16x4xi1> to vector<16x16x4xi32>
    %6 = arith.sitofp %5 : vector<16x16x4xi32> to vector<16x16x4xf32>
    %7 = arith.truncf %6 : vector<16x16x4xf32> to vector<16x16x4xbf16>
    %8 = vector.shape_cast %7 : vector<16x16x4xbf16> to vector<16x64xbf16>
    %c0_1 = arith.constant 0 : index
    %c0_2 = arith.constant 0 : index
    %9 = vector.load %arg3[%c0_1, %c0_2] : memref<64x128xbf16, #tpu.memory_space<vmem>>, vector<64x128xbf16>
    %cst = arith.constant dense<0.000000e+00> : vector<16x128xf32>
    %10 = tpu.matmul %8, %9, %cst {dimension_numbers = #tpu.dot_dimension_numbers<[1], [0], [0], [1], [0, 0, 1, 1], [], []>} : vector<16x64xbf16>, vector<64x128xbf16>, vector<16x128xf32> -> vector<16x128xf32>
    %c0_3 = arith.constant 0 : index
    %c0_4 = arith.constant 0 : index
    %11 = vector.load %arg4[%c0_3, %c0_4] : memref<16x128xbf16, #tpu.memory_space<vmem>>, vector<16x128xbf16>
    %12 = arith.extf %11 : vector<16x128xbf16> to vector<16x128xf32>
    %13 = arith.addf %10, %12 : vector<16x128xf32>
    %c0_5 = arith.constant 0 : index
    %c0_6 = arith.constant 0 : index
    %14 = vector.load %arg5[%c0_5, %c0_6] : memref<16x128xf32, #tpu.memory_space<vmem>>, vector<16x128xf32>
    tpu.vector_store %arg5[%c0_5, %c0_6], %13 {strides = array<i32>} : memref<16x128xf32, #tpu.memory_space<vmem>>, vector<16x128xf32>,
    return
  }
  func.func @transform_0(%arg0: i32, %arg1: i32) -> (i32, i32) {
    %c1_i32 = arith.constant 1 : i32
    %0 = arith.muli %arg1, %c1_i32 : i32
    %1 = arith.addi %0, %arg0 : i32
    %c0_i32 = arith.constant 0 : i32
    %c0_i32_0 = arith.constant 0 : i32
    return %1, %c0_i32 : i32, i32
  }
  func.func @transform_1(%arg0: i32, %arg1: i32) -> (i32, i32) {
    %c0_i32 = arith.constant 0 : i32
    %c0_i32_0 = arith.constant 0 : i32
    %c0_i32_1 = arith.constant 0 : i32
    return %c0_i32, %c0_i32_0 : i32, i32
  }
  func.func @transform_2(%arg0: i32, %arg1: i32) -> (i32, i32) {
    %c0_i32 = arith.constant 0 : i32
    %c0_i32_0 = arith.constant 0 : i32
    return %arg0, %c0_i32 : i32, i32
  }
  func.func @transform_3(%arg0: i32, %arg1: i32) -> (i32, i32) {
    %c1_i32 = arith.constant 1 : i32
    %0 = arith.muli %arg1, %c1_i32 : i32
    %1 = arith.addi %0, %arg0 : i32
    %c0_i32 = arith.constant 0 : i32
    %c0_i32_0 = arith.constant 0 : i32
    return %1, %c0_i32 : i32, i32
  }
}

module attributes {stable_mosaic.version = 11 : i64} {
  func.func @kernel(%arg0: i32, %arg1: i32, %arg2: memref<16x16xi32, #tpu.memory_space<vmem>>, %arg3: memref<64x128xbf16, #tpu.memory_space<vmem>>, %arg4: memref<16x128xbf16, #tpu.memory_space<vmem>>, %arg5: memref<16x128xf32, #tpu.memory_space<vmem>>) attributes {dimension_semantics = [#tpu.dimension_semantics<parallel>, #tpu.dimension_semantics<arbitrary>], iteration_bounds = array<i64: 1, 2>, scalar_prefetch = 0 : i64, scratch_operands = 0 : i64, tpu.core_type = #tpu.core_type<tc>, window_params = [{transform_indices = @transform_0, window_bounds = array<i64: 16, 16>}, {pipeline_mode = #tpu.pipeline_mode<synchronous>, transform_indices = @transform_1, window_bounds = array<i64: 64, 128>}, {transform_indices = @transform_2, window_bounds = array<i64: 16, 128>}, {transform_indices = @transform_3, window_bounds = array<i64: 16, 128>}]} {
    %c0 = arith.constant 0 : index
    %c0_0 = arith.constant 0 : index
    %0 = vector.load %arg2[%c0, %c0_0] : memref<16x16xi32, #tpu.memory_space<vmem>>, vector<16x16xi32>
    %1 = tpu.iota {dimensions = array<i32: 2>} : vector<16x16x4xi32>
    %2 = vector.shape_cast %0 : vector<16x16xi32> to vector<16x16x1xi32>
    %3 = vector.broadcast %2 : vector<16x16x1xi32> to vector<16x16x4xi32>
    %4 = arith.cmpi eq, %3, %1 : vector<16x16x4xi32>
    %5 = arith.extui %4 : vector<16x16x4xi1> to vector<16x16x4xi32>
    %6 = arith.sitofp %5 : vector<16x16x4xi32> to vector<16x16x4xf32>
    %7 = vector.shape_cast %6 : vector<16x16x4xf32> to vector<16x64xf32>
    %8 = arith.truncf %7 : vector<16x64xf32> to vector<16x64xbf16>
    %c0_1 = arith.constant 0 : index
    %c0_2 = arith.constant 0 : index
    %9 = vector.load %arg3[%c0_1, %c0_2] : memref<64x128xbf16, #tpu.memory_space<vmem>>, vector<64x128xbf16>
    %cst = arith.constant dense<0.000000e+00> : vector<16x128xf32>
    %10 = tpu.matmul %8, %9, %cst {dimension_numbers = #tpu.dot_dimension_numbers<[1], [0], [0], [1], [0, 0, 1, 1], [], []>} : vector<16x64xbf16>, vector<64x128xbf16>, vector<16x128xf32> -> vector<16x128xf32>
    %c0_3 = arith.constant 0 : index
    %c0_4 = arith.constant 0 : index
    %11 = vector.load %arg4[%c0_3, %c0_4] : memref<16x128xbf16, #tpu.memory_space<vmem>>, vector<16x128xbf16>
    %12 = arith.extf %11 : vector<16x128xbf16> to vector<16x128xf32>
    %13 = arith.addf %10, %12 : vector<16x128xf32>
    %c0_5 = arith.constant 0 : index
    %c0_6 = arith.constant 0 : index
    %14 = vector.load %arg5[%c0_5, %c0_6] : memref<16x128xf32, #tpu.memory_space<vmem>>, vector<16x128xf32>
    tpu.vector_store %arg5[%c0_5, %c0_6], %13 {strides = array<i32>} : memref<16x128xf32, #tpu.memory_space<vmem>>, vector<16x128xf32>,
    return
  }
  func.func @transform_0(%arg0: i32, %arg1: i32) -> (i32, i32) {
    %c1_i32 = arith.constant 1 : i32
    %0 = arith.muli %arg1, %c1_i32 : i32
    %1 = arith.addi %0, %arg0 : i32
    %c0_i32 = arith.constant 0 : i32
    %c0_i32_0 = arith.constant 0 : i32
    return %1, %c0_i32 : i32, i32
  }
  func.func @transform_1(%arg0: i32, %arg1: i32) -> (i32, i32) {
    %c0_i32 = arith.constant 0 : i32
    %c0_i32_0 = arith.constant 0 : i32
    %c0_i32_1 = arith.constant 0 : i32
    return %c0_i32, %c0_i32_0 : i32, i32
  }
  func.func @transform_2(%arg0: i32, %arg1: i32) -> (i32, i32) {
    %c0_i32 = arith.constant 0 : i32
    %c0_i32_0 = arith.constant 0 : i32
    return %arg0, %c0_i32 : i32, i32
  }
  func.func @transform_3(%arg0: i32, %arg1: i32) -> (i32, i32) {
    %c1_i32 = arith.constant 1 : i32
    %0 = arith.muli %arg1, %c1_i32 : i32
    %1 = arith.addi %0, %arg0 : i32
    %c0_i32 = arith.constant 0 : i32
    %c0_i32_0 = arith.constant 0 : i32
    return %1, %c0_i32 : i32, i32
  }
}

</mosaic_0001>

<bundles_post_ra>
// kernel: tpu_custom_call.1
= control target key start
LH: loop header
LB: loop body
LE: loop exit
PB: predicated region body
PF: predicated region fallthrough
CT: control target
= control target key end

     0   :  { %8 = vsyncpa [#allocation3], 0  ;;  %s1802_s0 = inlined_call_operand.vmem [shape: s32[32,16], index: 0, kind: input, shape index: {}]   ;;  %s1803_s1 = inlined_call_operand.vmem [shape: bf16[64,128], index: 1, kind: input, shape index: {}]   ;;  %s1804_s2 = inlined_call_operand.vmem [shape: bf16[16,128], index: 2, kind: input, shape index: {}]   ;;  %s1805_s3 = inlined_call_operand.hbm [shape: f32[32,128], index: 3, kind: output, shape index: {}]  }
   0x1   :  { %10 = vsyncpa [#allocation3 + $0x1], 0  ;;  %s1431_s12 = smov 0   ;;  %s1433_s13 = smov 0  }
   0x2   :  { %s1435_s14 = smov 0   ;;  %s1437_s15 = smov 0  }
   0x3   :  { %s1439_s16 = smov 0   ;;  %s1441_s17 = smov 0  }
   0x4 LB: > { %s1160_s18 = sadd.s32 4294967295, %s1390_s17   ;;  %s1161_s19 = sadd.s32 4294967294, %s1390_s17   ;;  %s1390_s17 = sphi %s1441_s17, %s16_s17   ;;  %s1386_s16 = sphi %s1439_s16, %s1812_s16   ;;  %s1382_s15 = sphi %s1437_s15, %s1811_s15   ;;  %s1378_s14 = sphi %s1435_s14, %s1810_s14   ;;  %s1374_s13 = sphi %s1433_s13, %s1809_s13   ;;  %s1370_s12 = sphi %s1431_s12, %s1808_s12  }
   0x5   : > { %s25_s20 = sadd.s32 1, %s1386_s16  ;;  %s112_s21 = sadd.s32 1, %s1378_s14 }
   0x6   : > { %p26_p0 = scmp.ge.s32.totalorder %s25_s20, 2  ;;  %p122_p1 = scmp.ne.s32.totalorder %s1378_s14, %s1374_s13 }
   0x7   : > { %p123_p2 = scmp.eq.s32.totalorder %s1160_s18, 1  ;;  %p128_p3 = scmp.ne.s32.totalorder %s1374_s13, %s1370_s12 }
   0x8   : > { %s1814_s20 = smov (%p26_p0, %s25_s20), 0  ;;  %p129_p5 = scmp.eq.s32.totalorder %s1161_s19, 1 }
   0x9   : > { %p1471_p4 = por %p123_p2, %p122_p1  ;;  %s109_s23 = ssub.s32 %s1386_s16, %s1814_s20 }
   0xa   : > { %p1165_p6 = scmp.ge.s32.totalorder %s1390_s17, 1  ;;  %p110_p7 = scmp.eq.s32.totalorder %s109_s23, 0 }
   0xb   : > { %p1478_p8 = por %p129_p5, %p128_p3  ;;  %p170_p9 = scmp.lt.s32.totalorder %s1390_s17, 3 }
   0xc   : > { %s1484_s25 = scalar_select %p110_p7, %s1378_s14, %s112_s21  }
   0xd   : > { %p171_p10 = pnand %p1165_p6, %p170_p9 }
   0xe   : > { %s1167_s26 = sshll.u32 (!%p171_p10), %s1382_s15, 1  ;;  %s1395_s4 = smov (!%p171_p10), 16  }
   0xf   : > { %174 = sbr.rel (%p171_p10) target bundleno = 532 (0x214), region = 32  ;;  %p202_p11 = scmp.lt.s32.totalorder (!%p171_p10), %s1167_s26, 3 }
  0x10   : > { %s1396_s5 = smov (!%p171_p10), 20   ;;  %s1397_s6 = smov (!%p171_p10), 24  }
  0x11   : > { %s1398_s7 = smov (!%p171_p10), 4   ;;  %s1399_s8 = smov (!%p171_p10), 28  }
  0x12   : > { %s1400_s9 = smov (!%p171_p10), 32   ;;  %s1401_s10 = smov (!%p171_p10), 36  }
  0x13   : > { %s1402_s11 = smov (!%p171_p10), 40   ;;  %s1403_s18 = smov (!%p171_p10), 8  }
  0x14   : > { %v219_v0 = vlaneseq  ;;  %s1816_s26 = smov (!%p202_p11, %s1167_s26), 3  ;;  %v1392_v33 = vmov 1983009808   ;;  %vm558_vm2 = vcmask 1047556   ;;  %v1393_v39 = vmov 0.0   ;;  %s1404_s19 = smov 12  }
  0x15   : > { %s1168_s27 = sshll.u32 %s1816_s26, 3  ;;  %v561_v34 = vunpack.c.l.s4 %v1392_v33  ;;  %s1405_s21 = smov 52  }
  0x16   : > { %v223_v1 = vshrl.u32 %v219_v0, 7  ;;  %s205_s30 = scalar_lea.vmem %s1802_s0, %s1168_s27  ;;  %v1494_v32 = vand.u32 127, %v219_v0  ;;  %s1406_s23 = smov 44  }
  0x17   : > { %v218_v2 = vld [vmem:[%s205_s30 + $0x8] sm:$0xff]  ;;  %v217_v3 = vld [vmem:[%s205_s30] sm:$0xff]  ;;  %v1506_v38 = vunpack.c.0.s8 %v561_v34  ;;  %s1407_s26 = smov 48   ;;  %s1408_s27 = smov 56  }
  0x18   : > { %1308 = vset.pattern.permute.xlu2 %v223_v1  ;;  %1307 = vset.pattern.permute.xlu1 %v223_v1  ;;  %v403_v4 = vperm.slane %v218_v2, 6  ;;  %v247_v5 = vperm.slane %v217_v3, 2  ;;  %v299_v6 = vperm.slane %v217_v3, 6  ;;  %v416_v7 = vperm.slane %v218_v2, 7  ;;  %s1409_s28 = smov 60  }
  0x19   : > { %1306 = vset.pattern.permute.xlu0 %v223_v1  ;;  %v260_v8 = vperm.slane %v217_v3, 3  ;;  %v312_v9 = vperm.slane %v217_v3, 7  ;;  %v286_v10 = vperm.slane %v217_v3, 5  ;;  %v351_v11 = vperm.slane %v218_v2, 2 }
  0x1a   : > { %v273_v12 = vperm.slane %v217_v3, 4  ;;  %v377_v13 = vperm.slane %v218_v2, 4  ;;  %v390_v14 = vperm.slane %v218_v2, 5  ;;  %v364_v15 = vperm.slane %v218_v2, 3 }
  0x1b   : > { %v325_v16 = vperm.slane %v218_v2, 0  ;;  %v234_v17 = vperm.slane %v217_v3, 1  ;;  %v221_v18 = vperm.slane %v217_v3, 0  ;;  %v230_v19 = vadd.s32 8, %v223_v1 }
  0x1c   : > { %v338_v20 = vperm.slane %v218_v2, 1 }
  0x20   : > { %408 = vperm.xlu1 %1307, %v403_v4   ;;  %252 = vperm.xlu2 %1308, %v247_v5  }
  0x21   : > { %304 = vperm.xlu0 %1306, %v299_v6  }
  0x28   : > { %421 = vperm.xlu1 %1307, %v416_v7   ;;  %265 = vperm.xlu2 %1308, %v260_v8  }
  0x29   : > { %317 = vperm.xlu0 %1306, %v312_v9  }
  0x30   : > { %291 = vperm.xlu1 %1307, %v286_v10   ;;  %356 = vperm.xlu2 %1308, %v351_v11  }
  0x31   : > { %278 = vperm.xlu0 %1306, %v273_v12  }
  0x38   : > { %382 = vperm.xlu1 %1307, %v377_v13   ;;  %395 = vperm.xlu2 %1308, %v390_v14  }
  0x39   : > { %369 = vperm.xlu0 %1306, %v364_v15  }
  0x40   : > { %330 = vperm.xlu2 %1308, %v325_v16   ;;  %239 = vperm.xlu1 %1307, %v234_v17  }
  0x41   : > { %226 = vperm.xlu0 %1306, %v221_v18  }
  0x48   : > { %1310 = vset.pattern.permute.xlu2 %v230_v19  ;;  %1309 = vset.pattern.permute.xlu1 %v230_v19 }
  0x49   : > { %343 = vperm.xlu0 %1306, %v338_v20  }
  0x50   : > { %323 = vperm.xlu2 %1310, %v312_v9   ;;  %310 = vperm.xlu1 %1309, %v299_v6  }
  0x51   : > { %1311 = vset.pattern.permute.xlu0 %v230_v19 }
  0x58   : > { %258 = vperm.xlu2 %1310, %v247_v5   ;;  %427 = vperm.xlu1 %1309, %v416_v7  }
  0x59   : > { %414 = vperm.xlu0 %1311, %v403_v4  }
  0x60   : > { %284 = vperm.xlu2 %1310, %v273_v12   ;;  %271 = vperm.xlu1 %1309, %v260_v8   ;;  %v1394_v12 = vmov 1934713408  }
  0x61   : > { %297 = vperm.xlu0 %1311, %v286_v10  }
  0x68   : > { %375 = vperm.xlu2 %1310, %v364_v15   ;;  %362 = vperm.xlu1 %1309, %v351_v11  }
  0x69   : > { %388 = vperm.xlu0 %1311, %v377_v13   ;;  %v575_v13 = vunpack.c.l.s4 %v1394_v12 }
  0x70   : > { %401 = vperm.xlu1 %1309, %v390_v14   ;;  %232 = vperm.xlu2 %1310, %v221_v18  }
  0x71   : > { %245 = vperm.xlu0 %1311, %v234_v17  }
  0x78   : > { %336 = vperm.xlu1 %1309, %v325_v16   ;;  %349 = vperm.xlu2 %1310, %v338_v20  }
  0x7a   : > { %v253_v21 = vpop.permute.xlu2 %252 }
  0x7b   : > { %vm433_vm5 = vcmp.eq.s32.totalorder %v253_v21, %v1494_v32 }
  0x7c   : > { %v1173_v46 = vsel %vm433_vm5, 1.0, %v1393_v39 }
  0x7d   : > { %v529_v55 = vpack.c.bf16 %v1173_v46, %v1173_v46 }
  0x82   : > { %v266_v22 = vpop.permute.xlu2 %265 }
  0x83   : > { %vm435_vm6 = vcmp.eq.s32.totalorder %v266_v22, %v1494_v32 }
  0x84   : > { %v1175_v47 = vsel %vm435_vm6, 1.0, %v1393_v39 }
  0x85   : > { %v531_v56 = vpack.c.bf16 %v1175_v47, %v1175_v47 }
  0x8a   : > { %v357_v23 = vpop.permute.xlu2 %356 }
  0x8b   : > { %vm449_vm11 = vcmp.eq.s32.totalorder %v357_v23, %v1494_v32 }
  0x8c   : > { %v1189_v59 = vsel %vm449_vm11, 1.0, %v1393_v39 }
  0x8d   : > { %v545_v10 = vpack.c.bf16 %v1189_v59, %v1189_v59 }
  0x92   : > { %v409_v24 = vpop.permute.xlu1 %408  ;;  %v1491_v26 = vpop.permute.xlu2 %395 }
  0x93   : > { %v305_v25 = vpop.permute.xlu0 %304  ;;  %vm457_vm0 = vcmp.eq.s32.totalorder %v409_v24, %v1494_v32  ;;  %vm455_vm13 = vcmp.eq.s32.totalorder %v1491_v26, %v1494_v32 }
  0x94   : > { %vm441_vm1 = vcmp.eq.s32.totalorder %v305_v25, %v1494_v32  ;;  %v1197_v40 = vsel %vm457_vm0, 1.0, %v1393_v39  ;;  %v1195_v15 = vsel %vm455_vm13, 1.0, %v1393_v39 }
  0x95   : > { %v1181_v41 = vsel %vm441_vm1, 1.0, %v1393_v39  ;;  %v553_v49 = vpack.c.bf16 %v1197_v40, %v1197_v40 }
  0x96   : > { %v537_v50 = vpack.c.bf16 %v1181_v41, %v1181_v41 }
  0x97   : > { %v620_v62 = vrot.slane %v553_v49, 4 }
  0x98   : > { %v564_v3 = vrot.slane %v537_v50, 4 }
  0x99   : > { %v621_v19 = vsel %vm558_vm2, %v620_v62, %v545_v10 }
  0x9a   : > { %v422_v27 = vpop.permute.xlu1 %421  ;;  %v331_v29 = vpop.permute.xlu2 %330  ;;  %v565_v23 = vsel %vm558_vm2, %v564_v3, %v529_v55 }
  0x9b   : > { %v318_v28 = vpop.permute.xlu0 %317  ;;  %vm445_vm4 = vcmp.eq.s32.totalorder %v331_v29, %v1494_v32  ;;  %vm459_vm10 = vcmp.eq.s32.totalorder %v422_v27, %v1494_v32  ;;  %v551_v27 = vpack.c.bf16 %v1195_v15, %v1195_v15  ;;  %v569_v34 = vperm.slane %v565_v23, %v1506_v38 }
  0x9c   : > { %vm443_vm3 = vcmp.eq.s32.totalorder %v318_v28, %v1494_v32  ;;  %v1185_v44 = vsel %vm445_vm4, 1.0, %v1393_v39  ;;  %v1199_v57 = vsel %vm459_vm10, 1.0, %v1393_v39 }
  0x9d   : > { %v1183_v43 = vsel %vm443_vm3, 1.0, %v1393_v39  ;;  %v541_v53 = vpack.c.bf16 %v1185_v44, %v1185_v44  ;;  %v555_v4 = vpack.c.bf16 %v1199_v57, %v1199_v57  ;;  %v570_v57 = vrot.slane %v569_v34, 4 }
  0x9e   : > { %v539_v52 = vpack.c.bf16 %v1183_v43, %v1183_v43 }
  0x9f   : > { %v648_v20 = vrot.slane %v555_v4, 4 }
  0xa0   : > { %v592_v5 = vrot.slane %v539_v52, 4 }
  0xa2   : > { %v292_v30 = vpop.permute.xlu1 %291  ;;  %v593_v21 = vsel %vm558_vm2, %v592_v5, %v531_v56 }
  0xa3   : > { %v279_v31 = vpop.permute.xlu0 %278  ;;  %vm439_vm7 = vcmp.eq.s32.totalorder %v292_v30, %v1494_v32  ;;  %v625_v30 = vperm.slane %v621_v19, %v1506_v38 }
  0xa4   : > { %vm437_vm9 = vcmp.eq.s32.totalorder %v279_v31, %v1494_v32  ;;  %v1179_v48 = vsel %vm439_vm7, 1.0, %v1393_v39  ;;  %v597_v31 = vperm.slane %v593_v21, %v1506_v38 }
  0xa5   : > { %v1177_v54 = vsel %vm437_vm9, 1.0, %v1393_v39  ;;  %v535_v58 = vpack.c.bf16 %v1179_v48, %v1179_v48  ;;  %v626_v48 = vrot.slane %v625_v30, 4 }
  0xa6   : > { %v533_v63 = vpack.c.bf16 %v1177_v54, %v1177_v54 }
  0xa7   : > { %v586_v7 = vrot.slane %v535_v58, 4 }
  0xa8   : > { %v557_v16 = vrot.slane %v533_v63, 4 }
  0xaa   : > { %v383_v35 = vpop.permute.xlu1 %382  ;;  %v1500_v36 = vpop.permute.xlu2 %323 }
  0xab   : > { %vm453_vm8 = vcmp.eq.s32.totalorder %v383_v35, %v1494_v32  ;;  %v370_v37 = vpop.permute.xlu0 %369  ;;  %v1549_v35 = vunpack.c.0.s8 %v575_v13  ;;  %vm444_vm3 = vcmp.eq.s32.totalorder %v1500_v36, %v1494_v32 }
  0xac   : > { %v1193_v42 = vsel %vm453_vm8, 1.0, %v1393_v39  ;;  %vm451_vm12 = vcmp.eq.s32.totalorder %v370_v37, %v1494_v32 }
  0xad   : > { %v549_v45 = vpack.c.bf16 %v1193_v42, %v1193_v42  ;;  %v1191_v0 = vsel %vm451_vm12, 1.0, %v1393_v39 }
  0xae   : > { %v547_v11 = vpack.c.bf16 %v1191_v0, %v1191_v0 }
  0xaf   : > { %v614_v51 = vrot.slane %v549_v45, 4  ;;  %v642_v45 = vrot.slane %v551_v27, 4 }
  0xb0   : > { %v649_v26 = vsel %vm558_vm2, %v648_v20, %v547_v11 }
  0xb1   : > { %v615_v60 = vsel %vm558_vm2, %v614_v51, %v541_v53  ;;  %v653_v40 = vperm.slane %v649_v26, %v1506_v38  ;;  %v598_v51 = vrot.slane %v597_v31, 4 }
  0xb2   : > { %v240_v61 = vpop.permute.xlu1 %239  ;;  %v1527_v1 = vpop.permute.xlu2 %258  ;;  %v619_v8 = vperm.slane %v615_v60, %v1506_v38 }
  0xb3   : > { %vm431_vm14 = vcmp.eq.s32.totalorder %v240_v61, %v1494_v32  ;;  %v227_v2 = vpop.permute.xlu0 %226  ;;  %v654_v55 = vrot.slane %v653_v40, 4  ;;  %vm434_vm4 = vcmp.eq.s32.totalorder %v1527_v1, %v1494_v32 }
  0xb4   : > { %v1171_v6 = vsel %vm431_vm14, 1.0, %v1393_v39  ;;  %vm429_vm15 = vcmp.eq.s32.totalorder %v227_v2, %v1494_v32  ;;  %v628_v24 = vrot.slane %v619_v8, 4  ;;  %v627_v54 = vsel %vm558_vm2, %v626_v48, %v619_v8 }
  0xb5   : > { %v527_v9 = vpack.c.bf16 %v1171_v6, %v1171_v6  ;;  %v1169_v14 = vsel %vm429_vm15, 1.0, %v1393_v39  ;;  %v1569_v3 = vperm.slane %v627_v54, %v1549_v35 }
  0xb6   : > { %v525_v18 = vpack.c.bf16 %v1169_v14, %v1169_v14  ;;  %v629_v44 = vsel %vm558_vm2, %v625_v30, %v628_v24 }
  0xb7   : > { %v587_v17 = vsel %vm558_vm2, %v586_v7, %v527_v9  ;;  %v637_v53 = vperm.slane %v629_v44, %v1549_v35  ;;  %v833_v21 = vshrl.u32 %v1569_v3, 16 }
  0xb8   : > { %v591_v22 = vperm.slane %v587_v17, %v1506_v38  ;;  %v559_v25 = vsel %vm558_vm2, %v557_v16, %v525_v18 }
  0xb9   : > { %v563_v29 = vperm.slane %v559_v25, %v1506_v38  ;;  %v640_v2 = vrot.slane %v637_v53, 4  ;;  %v845_v16 = vshrl.u32 %v637_v53, 16 }
  0xba   : > { %v600_v28 = vrot.slane %v591_v22, 4  ;;  %v1553_v41 = vpop.permute.xlu2 %284  ;;  %v599_v58 = vsel %vm558_vm2, %v598_v51, %v591_v22 }
  0xbb   : > { %v344_v33 = vpop.permute.xlu0 %343  ;;  %v572_v37 = vrot.slane %v563_v29, 4  ;;  %v571_v0 = vsel %vm558_vm2, %v570_v57, %v563_v29  ;;  %v1576_v8 = vperm.slane %v599_v58, %v1549_v35  ;;  %v641_v20 = vsel %vm558_vm2, 0, %v640_v2 }
  0xbc   : > { %vm447_vm0 = vcmp.eq.s32.totalorder %v344_v33, %v1494_v32  ;;  %v601_v43 = vsel %vm558_vm2, %v597_v31, %v600_v28  ;;  %v1580_v10 = vperm.slane %v571_v0, %v1549_v35  ;;  %vm438_vm5 = vcmp.eq.s32.totalorder %v1553_v41, %v1494_v32 }
  0xbd   : > { %v1187_v42 = vsel %vm447_vm0, 1.0, %v1393_v39  ;;  %v573_v47 = vsel %vm558_vm2, %v569_v34, %v572_v37  ;;  %v609_v50 = vperm.slane %v601_v43, %v1549_v35  ;;  %v786_v33 = vshrl.u32 %v1576_v8, 16 }
  0xbe   : > { %v543_v46 = vpack.c.bf16 %v1187_v42, %v1187_v42  ;;  %v581_v49 = vperm.slane %v573_v47, %v1549_v35  ;;  %v785_v31 = vshrl.u32 %v1580_v10, 16  ;;  %v851_v58 = vshrl.u32 %v641_v20, 16 }
  0xbf   : > { %v612_v63 = vrot.slane %v609_v50, 4  ;;  %v798_v7 = vshrl.u32 %v609_v50, 16 }
  0xc0   : > { %v643_v52 = vsel %vm558_vm2, %v642_v45, %v543_v46  ;;  %v584_v62 = vrot.slane %v581_v49, 4  ;;  %v797_v6 = vshrl.u32 %v581_v49, 16  ;;  %v796_v12 = vpack.i.b16 %v609_v50, %v581_v49 }
  0xc1   : > { %v647_v56 = vperm.slane %v643_v52, %v1506_v38  ;;  %v1588_v14 = vsel %vm558_vm2, 0, %v612_v63  ;;  %v787_v46 = vpack.i.b16 %v786_v33, %v785_v31 }
  0xc2   : > { %v311_v59 = vpop.permute.xlu1 %310  ;;  %v1582_v11 = vpop.permute.xlu2 %375  ;;  %v1585_v13 = vsel %vm558_vm2, 0, %v584_v62  ;;  %v799_v19 = vpack.i.b16 %v798_v7, %v797_v6  ;;  %v896_v29 = vunpack.c.l.b16 %v796_v12  ;;  %v804_v57 = vshrl.u32 %v1588_v14, 16 }
  0xc3   : > { %v655_v60 = vsel %vm558_vm2, %v654_v55, %v647_v56  ;;  %v656_v61 = vrot.slane %v647_v56, 4  ;;  %v802_v26 = vpack.i.b16 %v1588_v14, %v1585_v13  ;;  %vm442_vm1 = vcmp.eq.s32.totalorder %v311_v59, %v1494_v32 }
  0xc4   : > { %v1572_v4 = vperm.slane %v655_v60, %v1549_v35  ;;  %v1182_v45 = vsel %vm442_vm1, 1.0, %v1393_v39  ;;  %v881_v55 = vunpack.c.l.b16 %v787_v46  ;;  %v803_v56 = vshrl.u32 %v1585_v13, 16 }
  0xc5   : > { %v657_v5 = vsel %vm558_vm2, %v653_v40, %v656_v61  ;;  %v901_v40 = vunpack.c.l.b16 %v799_v19  ;;  %v906_v43 = vunpack.c.l.b16 %v802_v26  ;;  %v538_v52 = vpack.c.bf16 %v1182_v45, %v1182_v45 }
  0xc6   : > { %v665_v9 = vperm.slane %v657_v5, %v1549_v35  ;;  %v834_v22 = vshrl.u32 %v1572_v4, 16  ;;  %v1178_v59 = vsel %vm438_vm5, 1.0, %v1393_v39  ;;  %v1184_v61 = vsel %vm444_vm3, 1.0, %v1393_v39 }
  0xc7   : > { %v1174_v62 = vsel %vm434_vm4, 1.0, %v1393_v39  ;;  %v676_v63 = vrot.slane %v538_v52, 4  ;;  %v805_v5 = vpack.i.b16 %v804_v57, %v803_v56  ;;  %v534_v6 = vpack.c.bf16 %v1178_v59, %v1178_v59 }
  0xc8   : > { %v844_v15 = vpack.i.b16 %v665_v9, %v637_v53  ;;  %v846_v17 = vshrl.u32 %v665_v9, 16  ;;  %v668_v18 = vrot.slane %v665_v9, 4  ;;  %v835_v37 = vpack.i.b16 %v834_v22, %v833_v21 }
  0xc9   : > { %v540_v7 = vpack.c.bf16 %v1184_v61, %v1184_v61  ;;  %v530_v9 = vpack.c.bf16 %v1174_v62, %v1174_v62  ;;  %vm452_vm9 = vcmp.eq.s32.totalorder %v1582_v11, %v1494_v32  ;;  %v670_v19 = vrot.slane %v534_v6, 4 }
  0xca   : > { %v428_v23 = vpop.permute.xlu1 %427  ;;  %v897_v24 = vunpack.c.l.b16 %v844_v15  ;;  %v847_v25 = vpack.i.b16 %v846_v17, %v845_v16  ;;  %v669_v27 = vsel %vm558_vm2, 0, %v668_v18  ;;  %v233_v49 = vpop.permute.xlu2 %232  ;;  %v882_v50 = vunpack.c.l.b16 %v835_v37 }
  0xcb   : > { %v1596_v28 = vpop.permute.xlu0 %414  ;;  %v850_v30 = vpack.i.b16 %v669_v27, %v641_v20  ;;  %v852_v51 = vshrl.u32 %v669_v27, 16  ;;  %vm460_vm6 = vcmp.eq.s32.totalorder %v428_v23, %v1494_v32  ;;  %vm430_vm7 = vcmp.eq.s32.totalorder %v233_v49, %v1494_v32 }
  0xcc   : > { %v898_v34 = vpack.c.b16 %v897_v24, %v896_v29  ;;  %v902_v42 = vunpack.c.l.b16 %v847_v25  ;;  %v883_v41 = vpack.c.b16 %v882_v50, %v881_v55  ;;  %v1200_v0 = vsel %vm460_vm6, 1.0, %v1393_v39 }
  0xcd   : > { %v907_v44 = vunpack.c.l.b16 %v850_v30  ;;  %v853_v60 = vpack.i.b16 %v852_v51, %v851_v58  ;;  %v1170_v2 = vsel %vm430_vm7, 1.0, %v1393_v39  ;;  %v556_v12 = vpack.c.bf16 %v1200_v0, %v1200_v0 }
  0xce   : > { %899 = vrot.lane.b32.xlu0 %v898_v34, %s1395_s4  ;;  %v903_v47 = vpack.c.b16 %v902_v42, %v901_v40  ;;  %v526_v1 = vpack.c.bf16 %v1170_v2, %v1170_v2  ;;  %v784_v15 = vpack.i.b16 %v1576_v8, %v1580_v10  ;;  %v677_v16 = vsel %vm558_vm2, %v676_v63, %v530_v9 }
  0xcf   : > { %v908_v48 = vpack.c.b16 %v907_v44, %v906_v43  ;;  %v912_v36 = vunpack.c.l.b16 %v853_v60  ;;  %v911_v18 = vunpack.c.l.b16 %v805_v5  ;;  %v1192_v20 = vsel %vm452_vm9, 1.0, %v1393_v39 }
  0xd0   : > { %904 = vrot.lane.b32.xlu1 %v903_v47, %s1396_s5  ;;  %vm458_vm11 = vcmp.eq.s32.totalorder %v1596_v28, %v1494_v32  ;;  %v832_v22 = vpack.i.b16 %v1572_v4, %v1569_v3  ;;  %v704_v23 = vrot.slane %v540_v7, 4  ;;  %v1637_v24 = vperm.slane %v677_v16, %v1506_v38 }
  0xd1   : > { %909 = vrot.lane.b32.xlu2 %v908_v48, %s1397_s6  ;;  %v913_v21 = vpack.c.b16 %v912_v36, %v911_v18  ;;  %v760_v25 = vrot.slane %v556_v12, 4  ;;  %v671_v27 = vsel %vm558_vm2, %v670_v19, %v526_v1  ;;  %v1642_v30 = vunpack.c.l.b16 %v784_v15 }
  0xd2   : > { %v272_v53 = vpop.permute.xlu1 %271  ;;  %v350_v26 = vpop.permute.xlu2 %349  ;;  %v1644_v31 = vunpack.c.l.b16 %v832_v22  ;;  %v548_v33 = vpack.c.bf16 %v1192_v20, %v1192_v20  ;;  %v1198_v34 = vsel %vm458_vm11, 1.0, %v1393_v39  ;;  %v1651_v37 = vperm.slane %v671_v27, %v1506_v38 }
  0xd3   : > { %v298_v54 = vpop.permute.xlu0 %297  ;;  %vm436_vm8 = vcmp.eq.s32.totalorder %v272_v53, %v1494_v32  ;;  %vm448_vm13 = vcmp.eq.s32.totalorder %v350_v26, %v1494_v32  ;;  %v682_v43 = vrot.slane %v1637_v24, 4  ;;  %v554_v28 = vpack.c.bf16 %v1198_v34, %v1198_v34 }
  0xd4   : > { %v1176_v13 = vsel %vm436_vm8, 1.0, %v1393_v39  ;;  %vm440_vm10 = vcmp.eq.s32.totalorder %v298_v54, %v1494_v32  ;;  %v880_v42 = vpack.c.b16 %v1644_v31, %v1642_v30  ;;  %v761_v47 = vsel %vm558_vm2, %v760_v25, %v548_v33 }
  0xd5   : > { %v532_v11 = vpack.c.bf16 %v1176_v13, %v1176_v13  ;;  %v1180_v29 = vsel %vm440_vm10, 1.0, %v1393_v39  ;;  %v1188_v50 = vsel %vm448_vm13, 1.0, %v1393_v39  ;;  %v683_v52 = vsel %vm558_vm2, %v682_v43, %v1651_v37 }
  0xd6   : > { %884 = vrot.lane.b32.xlu0 %v883_v41, %s1398_s7  ;;  %v536_v44 = vpack.c.bf16 %v1180_v29, %v1180_v29  ;;  %v765_v56 = vperm.slane %v761_v47, %v1506_v38  ;;  %v732_v41 = vrot.slane %v554_v28, 4  ;;  %v544_v60 = vpack.c.bf16 %v1188_v50, %v1188_v50 }
  0xd7   : > { %v705_v40 = vsel %vm558_vm2, %v704_v23, %v532_v11  ;;  %v638_v62 = vrot.slane %v1569_v3, 4  ;;  %v689_v2 = vperm.slane %v683_v52, %v1549_v35  ;;  %v582_v13 = vrot.slane %v1580_v10, 4 }
  0xd8   : > { %v709_v49 = vperm.slane %v705_v40, %v1506_v38  ;;  %v698_v57 = vrot.slane %v536_v44, 4  ;;  %v766_v36 = vrot.slane %v765_v56, 4  ;;  %v666_v3 = vrot.slane %v1572_v4, 4 }
  0xd9   : > { %v610_v15 = vrot.slane %v1576_v8, 4  ;;  %v1684_v16 = vsel %vm558_vm2, 0, %v638_v62  ;;  %v684_v10 = vrot.slane %v1651_v37, 4  ;;  %v809_v43 = vshrl.u32 %v689_v2, 16 }
  0xda   : > { %v363_v14 = vpop.permute.xlu1 %362  ;;  %v710_v63 = vrot.slane %v709_v49, 4  ;;  %v667_v8 = vsel %vm558_vm2, 0, %v666_v3  ;;  %v839_v23 = vshrl.u32 %v1684_v16, 16  ;;  %vm960_vm3 = vcmask 64512  }
  0xdb   : > { %v389_v17 = vpop.permute.xlu0 %388  ;;  %vm450_vm12 = vcmp.eq.s32.totalorder %v363_v14, %v1494_v32  ;;  %v611_v37 = vsel %vm558_vm2, 0, %v610_v15  ;;  %v685_v40 = vsel %vm558_vm2, %v1637_v24, %v684_v10  ;;  %vm963_vm4 = vcmask 97280  }
  0xdc   : > { %v1190_v45 = vsel %vm450_vm12, 1.0, %v1393_v39  ;;  %vm454_vm14 = vcmp.eq.s32.totalorder %v389_v17, %v1494_v32  ;;  %vm966_vm5 = vcmask 130048   ;;  %vm969_vm6 = vcmask 162816  }
  0xdd   : > { %v546_v53 = vpack.c.bf16 %v1190_v45, %v1190_v45  ;;  %v1194_v58 = vsel %vm454_vm14, 1.0, %v1393_v39  ;;  %v838_v45 = vpack.i.b16 %v667_v8, %v1684_v16  ;;  %vm972_vm7 = vcmask 195584  }
  0xde   : > { %914 = vrot.lane.b32.xlu0 %v913_v21, %s1399_s8  ;;  %v550_v6 = vpack.c.bf16 %v1194_v58, %v1194_v58  ;;  %v694_v21 = vrot.slane %v689_v2, 4  ;;  %vm975_vm8 = vcmask 228352   ;;  %vm978_vm9 = vcmask 261120  }
  0xdf   : > { %v733_v5 = vsel %vm558_vm2, %v732_v41, %v546_v53  ;;  %vm981_vm10 = vcmask 293888   ;;  %vm984_vm11 = vcmask 326656   ;;  %vm987_vm12 = vcmask 359424  }
  0xe0   : > { %v737_v17 = vperm.slane %v733_v5, %v1506_v38  ;;  %v726_v4 = vrot.slane %v550_v6, 4  ;;  %v1703_v44 = vsel %vm558_vm2, 0, %v694_v21  ;;  %vm990_vm13 = vcmask 392192  }
  0xe1   : > { %vm993_vm14 = vcmask 424960  }
  0xe2   : > { %v402_v46 = vpop.permute.xlu1 %401  ;;  %v738_v29 = vrot.slane %v737_v17, 4 }
  0xe3   : > { %vm456_vm15 = vcmp.eq.s32.totalorder %v402_v46, %v1494_v32  ;;  %v246_v48 = vpop.permute.xlu0 %245 }
  0xe4   : > { %v1196_v51 = vsel %vm456_vm15, 1.0, %v1393_v39  ;;  %vm432_vm0 = vcmp.eq.s32.totalorder %v246_v48, %v1494_v32  ;;  %vm996_vm15 = vcmask 457728  }
  0xe5   : > { %v552_v54 = vpack.c.bf16 %v1196_v51, %v1196_v51  ;;  %v1172_v55 = vsel %vm432_vm0, 1.0, %v1393_v39  ;;  %vm999_vm0 = vcmask 490496  }
  0xe6   : > { %v528_v59 = vpack.c.bf16 %v1172_v55, %v1172_v55  ;;  %v840_v55 = vshrl.u32 %v667_v8, 16 }
  0xe7   : > { %v754_v61 = vrot.slane %v552_v54, 4 }
  0xe8   : > { %v699_v0 = vsel %vm558_vm2, %v698_v57, %v528_v59 }
  0xe9   : > { %v755_v7 = vsel %vm558_vm2, %v754_v61, %v544_v60  ;;  %v703_v9 = vperm.slane %v699_v0, %v1506_v38 }
  0xea   : > { %v759_v12 = vperm.slane %v755_v7, %v1506_v38  ;;  %v337_v1 = vpop.permute.xlu1 %336  ;;  %v693_v7 = vperm.slane %v685_v40, %v1549_v35 }
  0xeb   : > { %v711_v14 = vsel %vm558_vm2, %v710_v63, %v703_v9  ;;  %vm446_vm1 = vcmp.eq.s32.totalorder %v337_v1, %v1494_v32  ;;  %v712_v22 = vrot.slane %v703_v9, 4  ;;  %v1692_v32 = vsel %vm558_vm2, 0, %v582_v13 }
  0xec   : > { %v1186_v18 = vsel %vm446_vm1, 1.0, %v1393_v39  ;;  %v717_v19 = vperm.slane %v711_v14, %v1549_v35  ;;  %v767_v20 = vsel %vm558_vm2, %v766_v36, %v759_v12  ;;  %v768_v25 = vrot.slane %v759_v12, 4 }
  0xed   : > { %v542_v11 = vpack.c.bf16 %v1186_v18, %v1186_v18  ;;  %v773_v27 = vperm.slane %v767_v20, %v1549_v35  ;;  %v713_v46 = vsel %vm558_vm2, %v709_v49, %v712_v22  ;;  %v791_v6 = vshrl.u32 %v1692_v32, 16 }
  0xee   : > { %v722_v26 = vrot.slane %v717_v19, 4  ;;  %v810_v34 = vshrl.u32 %v717_v19, 16  ;;  %v808_v48 = vpack.i.b16 %v717_v19, %v689_v2  ;;  %v769_v24 = vsel %vm558_vm2, %v765_v56, %v768_v25 }
  0xef   : > { %v727_v39 = vsel %vm558_vm2, %v726_v4, %v542_v11  ;;  %v778_v51 = vrot.slane %v773_v27, 4  ;;  %v858_v54 = vshrl.u32 %v773_v27, 16  ;;  %v1720_v61 = vperm.slane %v713_v46, %v1549_v35 }
  0xf0   : > { %v731_v33 = vperm.slane %v727_v39, %v1506_v38  ;;  %v1710_v50 = vsel %vm558_vm2, 0, %v722_v26  ;;  %v811_v53 = vpack.i.b16 %v810_v34, %v809_v43  ;;  %v916_v41 = vunpack.c.l.b16 %v808_v48 }
  0xf1   : > { %v814_v60 = vpack.i.b16 %v1710_v50, %v1703_v44  ;;  %v1723_v56 = vperm.slane %v769_v24, %v1549_v35  ;;  %v779_v2 = vsel %vm558_vm2, 0, %v778_v51  ;;  %v792_v13 = vshrl.u32 %v611_v37, 16 }
  0xf2   : > { %v739_v47 = vsel %vm558_vm2, %v738_v29, %v731_v33  ;;  %v740_v28 = vrot.slane %v731_v33, 4  ;;  %v921_v12 = vunpack.c.l.b16 %v811_v53  ;;  %v822_v15 = vshrl.u32 %v1720_v61, 16 }
  0xf3   : > { %v745_v38 = vperm.slane %v739_v47, %v1549_v35  ;;  %v926_v3 = vunpack.c.l.b16 %v814_v60  ;;  %v870_v16 = vshrl.u32 %v1723_v56, 16  ;;  %v790_v18 = vpack.i.b16 %v611_v37, %v1692_v32 }
  0xf4   : > { %v741_v52 = vsel %vm558_vm2, %v737_v17, %v740_v28  ;;  %v841_v19 = vpack.i.b16 %v840_v55, %v839_v23  ;;  %v887_v4 = vunpack.c.l.b16 %v838_v45  ;;  %v793_v11 = vpack.i.b16 %v792_v13, %v791_v6 }
  0xf5   : > { %v856_v57 = vpack.i.b16 %v773_v27, %v745_v38  ;;  %v857_v58 = vshrl.u32 %v745_v38, 16  ;;  %v750_v49 = vrot.slane %v745_v38, 4  ;;  %v1715_v59 = vperm.slane %v741_v52, %v1549_v35 }
  0xf6   : > { %v821_v35 = vshrl.u32 %v693_v7, 16  ;;  %v886_v8 = vunpack.c.l.b16 %v790_v18  ;;  %v892_v25 = vunpack.c.l.b16 %v841_v19  ;;  %v816_v39 = vshrl.u32 %v1710_v50, 16 }
  0xf7   : > { %v917_v62 = vunpack.c.l.b16 %v856_v57  ;;  %v859_v63 = vpack.i.b16 %v858_v54, %v857_v58  ;;  %v751_v0 = vsel %vm558_vm2, 0, %v750_v49  ;;  %v869_v9 = vshrl.u32 %v1715_v59, 16 }
  0xf8   : > { %v862_v5 = vpack.i.b16 %v779_v2, %v751_v0  ;;  %v863_v21 = vshrl.u32 %v751_v0, 16  ;;  %v823_v22 = vpack.i.b16 %v822_v15, %v821_v35  ;;  %v864_v27 = vshrl.u32 %v779_v2, 16 }
  0xf9   : > { %v918_v36 = vpack.c.b16 %v917_v62, %v916_v41  ;;  %v922_v1 = vunpack.c.l.b16 %v859_v63  ;;  %v871_v10 = vpack.i.b16 %v870_v16, %v869_v9  ;;  %v752_v32 = vrot.slane %v1715_v59, 4 }
  0xfa   : > { %v927_v14 = vunpack.c.l.b16 %v862_v5  ;;  %v888_v23 = vpack.c.b16 %v887_v4, %v886_v8  ;;  %v891_v29 = vunpack.c.l.b16 %v793_v11  ;;  %v815_v33 = vshrl.u32 %v1703_v44, 16 }
  0xfb   : > { %919 = vrot.lane.b32.xlu1 %v918_v36, %s1400_s9  ;;  %v923_v17 = vpack.c.b16 %v922_v1, %v921_v12  ;;  %v942_v26 = vunpack.c.l.b16 %v871_v10  ;;  %v865_v34 = vpack.i.b16 %v864_v27, %v863_v21  ;;  %v941_v37 = vunpack.c.l.b16 %v823_v22  ;;  %v1226_v36 = vld [vmem:[%s1803_s1 + $0x18] sm:$0xff]  ;;  %v1225_v12 = vld [vmem:[%s1803_s1 + $0x10] sm:$0xff]  ;;  %s1332_s9 = scalar_lea.hbm %s1805_s3, 32 }
  0xfc   : > { %v928_v20 = vpack.c.b16 %v927_v14, %v926_v3  ;;  %v724_v40 = vrot.slane %v1720_v61, 4  ;;  %v780_v43 = vrot.slane %v1723_v56, 4  ;;  %v893_v45 = vpack.c.b16 %v892_v25, %v891_v29  ;;  %1045 = vmatpush.bf16.msra.mxu0 %v1226_v36  ;;  %v1224_v3 = vld [vmem:[%s1803_s1 + $0x8] sm:$0xff]  ;;  %v1223_v14 = vld [vmem:[%s1803_s1] sm:$0xff] }
  0xfd   : > { %924 = vrot.lane.b32.xlu2 %v923_v17, %s1401_s10  ;;  %v817_v46 = vpack.i.b16 %v816_v39, %v815_v33  ;;  %v868_v47 = vpack.i.b16 %v1723_v56, %v1715_v59  ;;  %v943_v28 = vpack.c.b16 %v942_v26, %v941_v37  ;;  %v820_v48 = vpack.i.b16 %v1720_v61, %v693_v7  ;;  %s197_s10 = sand.u32 1, %s1374_s13  }
  0xfe   : > { %929 = vrot.lane.b32.xlu0 %v928_v20, %s1402_s11  ;;  %v696_v38 = vrot.slane %v693_v7, 4  ;;  %v753_v44 = vsel %vm558_vm2, 0, %v752_v32  ;;  %v932_v50 = vunpack.c.l.b16 %v865_v34  ;;  %v725_v51 = vsel %vm558_vm2, 0, %v724_v40  ;;  %s1058_s5 = scalar_lea.sflag [#allocation3], %s197_s10 }
  0xff   : > { %v781_v24 = vsel %vm558_vm2, 0, %v780_v43  ;;  %v931_v52 = vunpack.c.l.b16 %v817_v46  ;;  %v937_v53 = vunpack.c.l.b16 %v868_v47  ;;  %v875_v54 = vshrl.u32 %v753_v44, 16 }
 0x100   : > { %v936_v55 = vunpack.c.l.b16 %v820_v48  ;;  %v697_v57 = vsel %vm558_vm2, 0, %v696_v38  ;;  %v874_v49 = vpack.i.b16 %v781_v24, %v753_v44  ;;  %v828_v59 = vshrl.u32 %v725_v51, 16  ;;  %1046 = vmatpush.bf16.msra.mxu0 %v1225_v12 }
 0x101   : > { %v933_v58 = vpack.c.b16 %v932_v50, %v931_v52  ;;  %v876_v41 = vshrl.u32 %v781_v24, 16  ;;  %v826_v61 = vpack.i.b16 %v725_v51, %v697_v57  ;;  %v827_v56 = vshrl.u32 %v697_v57, 16 }
 0x102   : > { %v938_v60 = vpack.c.b16 %v937_v53, %v936_v55  ;;  %v947_v63 = vunpack.c.l.b16 %v874_v49  ;;  %vm956_vm2 = vcmask 31744   ;;  %vm1038_vm1 = vcmask 523264  }
 0x103   : > { %889 = vrot.lane.b32.xlu1 %v888_v23, %s1403_s18  ;;  %v877_v62 = vpack.i.b16 %v876_v41, %v875_v54  ;;  %v829_v0 = vpack.i.b16 %v828_v59, %v827_v56  ;;  %v946_v2 = vunpack.c.l.b16 %v826_v61 }
 0x104   : > { %1047 = vmatpush.bf16.msra.mxu0 %v1224_v3 }
 0x105   : > { %894 = vrot.lane.b32.xlu2 %v893_v45, %s1404_s19  ;;  %v952_v5 = vunpack.c.l.b16 %v877_v62  ;;  %v948_v6 = vpack.c.b16 %v947_v63, %v946_v2  ;;  %v951_v7 = vunpack.c.l.b16 %v829_v0  ;;  %v1229_v45 = vld [vmem:[%s1804_s2] sm:$0xff]  }
 0x106   : > { %944 = vrot.lane.b32.xlu0 %v943_v28, %s1405_s21  ;;  %s1166_s21 = sshll.u32 %s197_s10, 4  ;;  %v1230_v46 = vunpack.c.l.bf16 %v1229_v45  ;;  %v1231_v48 = vunpack.c.h.bf16 %v1229_v45 }
 0x107   : > { %v953_v9 = vpack.c.b16 %v952_v5, %v951_v7 }
 0x108   : > { %1048 = vmatpush.bf16.msra.mxu0 %v1223_v14 }
 0x10b   : > { %934 = vrot.lane.b32.xlu1 %v933_v58, %s1406_s23  ;;  %s1227_s23 = sshll.u32 %s1382_s15, 4 }
 0x10c   : > { %s1070_s29 = scalar_lea.hbm %s1805_s3, %s1227_s23 }
 0x10d   : > { %939 = vrot.lane.b32.xlu2 %v938_v60, %s1407_s26  ;;  %s199_s26 = scalar_lea.vmem [#allocation2], %s1166_s21  ;;  %s1073_s4 = sshll.u32 %s1070_s29, 4  ;;  %s1074_s4 = int_to_ptr.hbm [resolvable:$true] %s1073_s4 }
 0x10e   : > { %s1071_s30 = sshll.u32 %s199_s26, 4  ;;  %s1326_s6 = sshra.s32 %s1074_s4, 4  ;;  %s1072_s30 = int_to_ptr.vmem [resolvable:$true] %s1071_s30  ;;  %s1327_s6 = int_to_ptr.hbm [resolvable:$true] %s1326_s6 }
 0x10f   : > { %s1328_s15 = scalar_lea.hbm %s1327_s6, 16  ;;  %p1333_p1 = scmp.lt.s32.totalorder %s1327_s6, %s1805_s3 }
 0x110   : > { %p1329_p12 = scmp.ne.s32.totalorder %s1327_s6, %s1328_s15  ;;  %p1334_p2 = scmp.lt.s32.totalorder %s1332_s9, %s1328_s15 }
 0x112   : > { %p1330_p13 = pnand %p1329_p12, %p1471_p4  ;;  %p1335_p3 = por %p1334_p2, %p1333_p1 }
 0x113   : > { %949 = vrot.lane.b32.xlu1 %v948_v6, %s1408_s27 }
 0x114   : > { %p1331_p0 = pneg %p1330_p13 }
 0x115   : > { %954 = vrot.lane.b32.xlu2 %v953_v9, %s1409_s28 }
 0x116   : > { %p1336_p5 = pnand %p1335_p3, %p1331_p0 }
 0x12b   : > { %v910_v13 = vpop.permute.xlu2 %909 }
 0x140   : > { %v900_v1 = vpop.permute.xlu0 %899 }
 0x142   : > { %v905_v15 = vpop.permute.xlu1 %904 }
 0x148   : > { %v885_v16 = vpop.permute.xlu0 %884 }
 0x149   : > { %v959_v35 = vsel %vm956_vm2, %v880_v42, %v885_v16 }
 0x150   : > { %v915_v19 = vpop.permute.xlu0 %914 }
 0x157   : > { %v925_v17 = vpop.permute.xlu2 %924 }
 0x15f   : > { %v895_v20 = vpop.permute.xlu2 %894 }
 0x167   : > { %v940_v27 = vpop.permute.xlu2 %939 }
 0x16d   : > { %v920_v18 = vpop.permute.xlu1 %919 }
 0x16f   : > { %v955_v37 = vpop.permute.xlu2 %954 }
 0x170   : > { %v930_v8 = vpop.permute.xlu0 %929 }
 0x175   : > { %v890_v10 = vpop.permute.xlu1 %889 }
 0x176   : > { %v962_v4 = vsel %vm960_vm3, %v959_v35, %v890_v10 }
 0x177   : > { %v965_v11 = vsel %vm963_vm4, %v962_v4, %v895_v20 }
 0x178   : > { %v968_v21 = vsel %vm966_vm5, %v965_v11, %v900_v1  ;;  %v945_v29 = vpop.permute.xlu0 %944 }
 0x179   : > { %v971_v22 = vsel %vm969_vm6, %v968_v21, %v905_v15 }
 0x17a   : > { %v974_v25 = vsel %vm972_vm7, %v971_v22, %v910_v13 }
 0x17b   : > { %v977_v39 = vsel %vm975_vm8, %v974_v25, %v915_v19 }
 0x17c   : > { %v980_v26 = vsel %vm978_vm9, %v977_v39, %v920_v18 }
 0x17d   : > { %v935_v30 = vpop.permute.xlu1 %934  ;;  %v983_v31 = vsel %vm981_vm10, %v980_v26, %v925_v17 }
 0x17e   : > { %v986_v42 = vsel %vm984_vm11, %v983_v31, %v930_v8 }
 0x17f   : > { %v989_v32 = vsel %vm987_vm12, %v986_v42, %v935_v30 }
 0x180   : > { %v992_v23 = vsel %vm990_vm13, %v989_v32, %v940_v27 }
 0x181   : > { %v995_v34 = vsel %vm993_vm14, %v992_v23, %v945_v29 }
 0x185   : > { %v950_v33 = vpop.permute.xlu1 %949 }
 0x186   : > { %v998_v40 = vsel %vm996_vm15, %v995_v34, %v950_v33 }
 0x187   : > { %v1001_v43 = vsel %vm999_vm0, %v998_v40, %v955_v37 }
 0x188   : > { %1217 = vmatmul.msk.bf16.vlgmr.msra.gmra.mxu0 %vm1038_vm1, %v1001_v43 }
 0x205   : > { %v1050_v47 = vpop.f32.mrf.mxu0 }
 0x206   : > { %v1051_v28 = vadd.f32 %v1230_v46, %v1050_v47 }
 0x208   : > { %1055 = vst [vmem:[%s199_s26] sm:$0xff] %v1051_v28 }
 0x20d   : > { %v1052_v38 = vpop.f32.mrf.mxu0 }
 0x20e   : > { %v1053_v44 = vadd.f32 %v1231_v48, %v1052_v38 }
 0x210   : > { %1056 = vst [vmem:[%s199_s26 + $0x8] sm:$0xff] %v1053_v44 }
 0x211   : > { %1339 = shalt.err (!%p1336_p5)
}
 0x212   : > { %s1410_s10 = smov 128  }
 0x213   : > { %1232 = dma.vmem_to_hbm [thread:$0]  (%p1471_p4), %s1072_s30, 256, %s1074_s4, %s1058_s5, %s1410_s10, %s1410_s10, %s1403_s18  }
 0x214 PF: > { %p1238_p6 = scmp.ge.s32.totalorder %s1390_s17, 2  ;;  %s1088_s21 = sand.u32 1, %s1370_s12  }
 0x215   : > { %s1089_s23 = scalar_lea.sflag [#allocation3], %s1088_s21 }
 0x216   : > { %p1235_p7 = pnand %p1238_p6, %p1478_p8 }
 0x218   : > { %p1236_p9 = pneg %p1235_p7 }
 0x21a   : > { %1365 = dma.done.wait (%p1236_p9), %s1089_s23, 256  }
 0x21b   : > { %1367 = vsyncadd (%p1236_p9), %s1089_s23, 4294967040  ;;  %s16_s17 = sadd.s32 1, %s1390_s17   ;;  %s1808_s12 = smov %s1374_s13 }
 0x21c   : > { %p13_p10 = scmp.ge.s32.totalorder %s16_s17, 4   ;;  %s1809_s13 = smov %s1378_s14 }
 0x21d   : > { %s1810_s14 = smov %s1484_s25  ;;  %s1811_s15 = smov %s1386_s16 }
 0x21e   : > { %s1812_s16 = smov %s1814_s20  ;;  %15 = sbr.rel (!%p13_p10) target bundleno = 4 (0x4), region = 70 }
 0x223   :  { %1095 = vsyncpa [#allocation3], 1 }
 0x224   :  { %1097 = vsyncpa [#allocation3 + $0x1], 1 }

// kernel: tpu_custom_call.1
= control target key start
LH: loop header
LB: loop body
LE: loop exit
PB: predicated region body
PF: predicated region fallthrough
CT: control target
= control target key end

     0   :  { %8 = vsyncpa [#allocation3], 0  ;;  %s1802_s0 = inlined_call_operand.vmem [shape: s32[32,16], index: 0, kind: input, shape index: {}]   ;;  %s1803_s1 = inlined_call_operand.vmem [shape: bf16[64,128], index: 1, kind: input, shape index: {}]   ;;  %s1804_s2 = inlined_call_operand.vmem [shape: bf16[16,128], index: 2, kind: input, shape index: {}]   ;;  %s1805_s3 = inlined_call_operand.hbm [shape: f32[32,128], index: 3, kind: output, shape index: {}]  }
   0x1   :  { %10 = vsyncpa [#allocation3 + $0x1], 0  ;;  %s1431_s12 = smov 0   ;;  %s1433_s13 = smov 0  }
   0x2   :  { %s1435_s14 = smov 0   ;;  %s1437_s15 = smov 0  }
   0x3   :  { %s1439_s16 = smov 0   ;;  %s1441_s17 = smov 0  }
   0x4 LB: > { %s1160_s18 = sadd.s32 4294967295, %s1390_s17   ;;  %s1161_s19 = sadd.s32 4294967294, %s1390_s17   ;;  %s1390_s17 = sphi %s1441_s17, %s16_s17   ;;  %s1386_s16 = sphi %s1439_s16, %s1812_s16   ;;  %s1382_s15 = sphi %s1437_s15, %s1811_s15   ;;  %s1378_s14 = sphi %s1435_s14, %s1810_s14   ;;  %s1374_s13 = sphi %s1433_s13, %s1809_s13   ;;  %s1370_s12 = sphi %s1431_s12, %s1808_s12  }
   0x5   : > { %s25_s20 = sadd.s32 1, %s1386_s16  ;;  %s112_s21 = sadd.s32 1, %s1378_s14 }
   0x6   : > { %p26_p0 = scmp.ge.s32.totalorder %s25_s20, 2  ;;  %p122_p1 = scmp.ne.s32.totalorder %s1378_s14, %s1374_s13 }
   0x7   : > { %p123_p2 = scmp.eq.s32.totalorder %s1160_s18, 1  ;;  %p128_p3 = scmp.ne.s32.totalorder %s1374_s13, %s1370_s12 }
   0x8   : > { %s1814_s20 = smov (%p26_p0, %s25_s20), 0  ;;  %p129_p5 = scmp.eq.s32.totalorder %s1161_s19, 1 }
   0x9   : > { %p1471_p4 = por %p123_p2, %p122_p1  ;;  %s109_s23 = ssub.s32 %s1386_s16, %s1814_s20 }
   0xa   : > { %p1165_p6 = scmp.ge.s32.totalorder %s1390_s17, 1  ;;  %p110_p7 = scmp.eq.s32.totalorder %s109_s23, 0 }
   0xb   : > { %p1478_p8 = por %p129_p5, %p128_p3  ;;  %p170_p9 = scmp.lt.s32.totalorder %s1390_s17, 3 }
   0xc   : > { %s1484_s25 = scalar_select %p110_p7, %s1378_s14, %s112_s21  }
   0xd   : > { %p171_p10 = pnand %p1165_p6, %p170_p9 }
   0xe   : > { %s1167_s26 = sshll.u32 (!%p171_p10), %s1382_s15, 1  ;;  %s1395_s4 = smov (!%p171_p10), 16  }
   0xf   : > { %174 = sbr.rel (%p171_p10) target bundleno = 532 (0x214), region = 32  ;;  %p202_p11 = scmp.lt.s32.totalorder (!%p171_p10), %s1167_s26, 3 }
  0x10   : > { %s1396_s5 = smov (!%p171_p10), 20   ;;  %s1397_s6 = smov (!%p171_p10), 24  }
  0x11   : > { %s1398_s7 = smov (!%p171_p10), 4   ;;  %s1399_s8 = smov (!%p171_p10), 28  }
  0x12   : > { %s1400_s9 = smov (!%p171_p10), 32   ;;  %s1401_s10 = smov (!%p171_p10), 36  }
  0x13   : > { %s1402_s11 = smov (!%p171_p10), 40   ;;  %s1403_s18 = smov (!%p171_p10), 8  }
  0x14   : > { %v219_v0 = vlaneseq  ;;  %s1816_s26 = smov (!%p202_p11, %s1167_s26), 3  ;;  %v1392_v33 = vmov 1983009808   ;;  %vm558_vm2 = vcmask 1047556   ;;  %v1393_v39 = vmov 0.0   ;;  %s1404_s19 = smov 12  }
  0x15   : > { %s1168_s27 = sshll.u32 %s1816_s26, 3  ;;  %v561_v34 = vunpack.c.l.s4 %v1392_v33  ;;  %s1405_s21 = smov 52  }
  0x16   : > { %v223_v1 = vshrl.u32 %v219_v0, 7  ;;  %s205_s30 = scalar_lea.vmem %s1802_s0, %s1168_s27  ;;  %v1494_v32 = vand.u32 127, %v219_v0  ;;  %s1406_s23 = smov 44  }
  0x17   : > { %v218_v2 = vld [vmem:[%s205_s30 + $0x8] sm:$0xff]  ;;  %v217_v3 = vld [vmem:[%s205_s30] sm:$0xff]  ;;  %v1506_v38 = vunpack.c.0.s8 %v561_v34  ;;  %s1407_s26 = smov 48   ;;  %s1408_s27 = smov 56  }
  0x18   : > { %1308 = vset.pattern.permute.xlu2 %v223_v1  ;;  %1307 = vset.pattern.permute.xlu1 %v223_v1  ;;  %v403_v4 = vperm.slane %v218_v2, 6  ;;  %v247_v5 = vperm.slane %v217_v3, 2  ;;  %v299_v6 = vperm.slane %v217_v3, 6  ;;  %v416_v7 = vperm.slane %v218_v2, 7  ;;  %s1409_s28 = smov 60  }
  0x19   : > { %1306 = vset.pattern.permute.xlu0 %v223_v1  ;;  %v260_v8 = vperm.slane %v217_v3, 3  ;;  %v312_v9 = vperm.slane %v217_v3, 7  ;;  %v286_v10 = vperm.slane %v217_v3, 5  ;;  %v351_v11 = vperm.slane %v218_v2, 2 }
  0x1a   : > { %v273_v12 = vperm.slane %v217_v3, 4  ;;  %v377_v13 = vperm.slane %v218_v2, 4  ;;  %v390_v14 = vperm.slane %v218_v2, 5  ;;  %v364_v15 = vperm.slane %v218_v2, 3 }
  0x1b   : > { %v325_v16 = vperm.slane %v218_v2, 0  ;;  %v234_v17 = vperm.slane %v217_v3, 1  ;;  %v221_v18 = vperm.slane %v217_v3, 0  ;;  %v230_v19 = vadd.s32 8, %v223_v1 }
  0x1c   : > { %v338_v20 = vperm.slane %v218_v2, 1 }
  0x20   : > { %408 = vperm.xlu1 %1307, %v403_v4   ;;  %252 = vperm.xlu2 %1308, %v247_v5  }
  0x21   : > { %304 = vperm.xlu0 %1306, %v299_v6  }
  0x28   : > { %421 = vperm.xlu1 %1307, %v416_v7   ;;  %265 = vperm.xlu2 %1308, %v260_v8  }
  0x29   : > { %317 = vperm.xlu0 %1306, %v312_v9  }
  0x30   : > { %291 = vperm.xlu1 %1307, %v286_v10   ;;  %356 = vperm.xlu2 %1308, %v351_v11  }
  0x31   : > { %278 = vperm.xlu0 %1306, %v273_v12  }
  0x38   : > { %382 = vperm.xlu1 %1307, %v377_v13   ;;  %395 = vperm.xlu2 %1308, %v390_v14  }
  0x39   : > { %369 = vperm.xlu0 %1306, %v364_v15  }
  0x40   : > { %330 = vperm.xlu2 %1308, %v325_v16   ;;  %239 = vperm.xlu1 %1307, %v234_v17  }
  0x41   : > { %226 = vperm.xlu0 %1306, %v221_v18  }
  0x48   : > { %1310 = vset.pattern.permute.xlu2 %v230_v19  ;;  %1309 = vset.pattern.permute.xlu1 %v230_v19 }
  0x49   : > { %343 = vperm.xlu0 %1306, %v338_v20  }
  0x50   : > { %323 = vperm.xlu2 %1310, %v312_v9   ;;  %310 = vperm.xlu1 %1309, %v299_v6  }
  0x51   : > { %1311 = vset.pattern.permute.xlu0 %v230_v19 }
  0x58   : > { %258 = vperm.xlu2 %1310, %v247_v5   ;;  %427 = vperm.xlu1 %1309, %v416_v7  }
  0x59   : > { %414 = vperm.xlu0 %1311, %v403_v4  }
  0x60   : > { %284 = vperm.xlu2 %1310, %v273_v12   ;;  %271 = vperm.xlu1 %1309, %v260_v8   ;;  %v1394_v12 = vmov 1934713408  }
  0x61   : > { %297 = vperm.xlu0 %1311, %v286_v10  }
  0x68   : > { %375 = vperm.xlu2 %1310, %v364_v15   ;;  %362 = vperm.xlu1 %1309, %v351_v11  }
  0x69   : > { %388 = vperm.xlu0 %1311, %v377_v13   ;;  %v575_v13 = vunpack.c.l.s4 %v1394_v12 }
  0x70   : > { %401 = vperm.xlu1 %1309, %v390_v14   ;;  %232 = vperm.xlu2 %1310, %v221_v18  }
  0x71   : > { %245 = vperm.xlu0 %1311, %v234_v17  }
  0x78   : > { %336 = vperm.xlu1 %1309, %v325_v16   ;;  %349 = vperm.xlu2 %1310, %v338_v20  }
  0x7a   : > { %v253_v21 = vpop.permute.xlu2 %252 }
  0x7b   : > { %vm433_vm5 = vcmp.eq.s32.totalorder %v253_v21, %v1494_v32 }
  0x7c   : > { %v1173_v46 = vsel %vm433_vm5, 1.0, %v1393_v39 }
  0x7d   : > { %v529_v55 = vpack.c.bf16 %v1173_v46, %v1173_v46 }
  0x82   : > { %v266_v22 = vpop.permute.xlu2 %265 }
  0x83   : > { %vm435_vm6 = vcmp.eq.s32.totalorder %v266_v22, %v1494_v32 }
  0x84   : > { %v1175_v47 = vsel %vm435_vm6, 1.0, %v1393_v39 }
  0x85   : > { %v531_v56 = vpack.c.bf16 %v1175_v47, %v1175_v47 }
  0x8a   : > { %v357_v23 = vpop.permute.xlu2 %356 }
  0x8b   : > { %vm449_vm11 = vcmp.eq.s32.totalorder %v357_v23, %v1494_v32 }
  0x8c   : > { %v1189_v59 = vsel %vm449_vm11, 1.0, %v1393_v39 }
  0x8d   : > { %v545_v10 = vpack.c.bf16 %v1189_v59, %v1189_v59 }
  0x92   : > { %v409_v24 = vpop.permute.xlu1 %408  ;;  %v1491_v26 = vpop.permute.xlu2 %395 }
  0x93   : > { %v305_v25 = vpop.permute.xlu0 %304  ;;  %vm457_vm0 = vcmp.eq.s32.totalorder %v409_v24, %v1494_v32  ;;  %vm455_vm13 = vcmp.eq.s32.totalorder %v1491_v26, %v1494_v32 }
  0x94   : > { %vm441_vm1 = vcmp.eq.s32.totalorder %v305_v25, %v1494_v32  ;;  %v1197_v40 = vsel %vm457_vm0, 1.0, %v1393_v39  ;;  %v1195_v15 = vsel %vm455_vm13, 1.0, %v1393_v39 }
  0x95   : > { %v1181_v41 = vsel %vm441_vm1, 1.0, %v1393_v39  ;;  %v553_v49 = vpack.c.bf16 %v1197_v40, %v1197_v40 }
  0x96   : > { %v537_v50 = vpack.c.bf16 %v1181_v41, %v1181_v41 }
  0x97   : > { %v620_v62 = vrot.slane %v553_v49, 4 }
  0x98   : > { %v564_v3 = vrot.slane %v537_v50, 4 }
  0x99   : > { %v621_v19 = vsel %vm558_vm2, %v620_v62, %v545_v10 }
  0x9a   : > { %v422_v27 = vpop.permute.xlu1 %421  ;;  %v331_v29 = vpop.permute.xlu2 %330  ;;  %v565_v23 = vsel %vm558_vm2, %v564_v3, %v529_v55 }
  0x9b   : > { %v318_v28 = vpop.permute.xlu0 %317  ;;  %vm445_vm4 = vcmp.eq.s32.totalorder %v331_v29, %v1494_v32  ;;  %vm459_vm10 = vcmp.eq.s32.totalorder %v422_v27, %v1494_v32  ;;  %v551_v27 = vpack.c.bf16 %v1195_v15, %v1195_v15  ;;  %v569_v34 = vperm.slane %v565_v23, %v1506_v38 }
  0x9c   : > { %vm443_vm3 = vcmp.eq.s32.totalorder %v318_v28, %v1494_v32  ;;  %v1185_v44 = vsel %vm445_vm4, 1.0, %v1393_v39  ;;  %v1199_v57 = vsel %vm459_vm10, 1.0, %v1393_v39 }
  0x9d   : > { %v1183_v43 = vsel %vm443_vm3, 1.0, %v1393_v39  ;;  %v541_v53 = vpack.c.bf16 %v1185_v44, %v1185_v44  ;;  %v555_v4 = vpack.c.bf16 %v1199_v57, %v1199_v57  ;;  %v570_v57 = vrot.slane %v569_v34, 4 }
  0x9e   : > { %v539_v52 = vpack.c.bf16 %v1183_v43, %v1183_v43 }
  0x9f   : > { %v648_v20 = vrot.slane %v555_v4, 4 }
  0xa0   : > { %v592_v5 = vrot.slane %v539_v52, 4 }
  0xa2   : > { %v292_v30 = vpop.permute.xlu1 %291  ;;  %v593_v21 = vsel %vm558_vm2, %v592_v5, %v531_v56 }
  0xa3   : > { %v279_v31 = vpop.permute.xlu0 %278  ;;  %vm439_vm7 = vcmp.eq.s32.totalorder %v292_v30, %v1494_v32  ;;  %v625_v30 = vperm.slane %v621_v19, %v1506_v38 }
  0xa4   : > { %vm437_vm9 = vcmp.eq.s32.totalorder %v279_v31, %v1494_v32  ;;  %v1179_v48 = vsel %vm439_vm7, 1.0, %v1393_v39  ;;  %v597_v31 = vperm.slane %v593_v21, %v1506_v38 }
  0xa5   : > { %v1177_v54 = vsel %vm437_vm9, 1.0, %v1393_v39  ;;  %v535_v58 = vpack.c.bf16 %v1179_v48, %v1179_v48  ;;  %v626_v48 = vrot.slane %v625_v30, 4 }
  0xa6   : > { %v533_v63 = vpack.c.bf16 %v1177_v54, %v1177_v54 }
  0xa7   : > { %v586_v7 = vrot.slane %v535_v58, 4 }
  0xa8   : > { %v557_v16 = vrot.slane %v533_v63, 4 }
  0xaa   : > { %v383_v35 = vpop.permute.xlu1 %382  ;;  %v1500_v36 = vpop.permute.xlu2 %323 }
  0xab   : > { %vm453_vm8 = vcmp.eq.s32.totalorder %v383_v35, %v1494_v32  ;;  %v370_v37 = vpop.permute.xlu0 %369  ;;  %v1549_v35 = vunpack.c.0.s8 %v575_v13  ;;  %vm444_vm3 = vcmp.eq.s32.totalorder %v1500_v36, %v1494_v32 }
  0xac   : > { %v1193_v42 = vsel %vm453_vm8, 1.0, %v1393_v39  ;;  %vm451_vm12 = vcmp.eq.s32.totalorder %v370_v37, %v1494_v32 }
  0xad   : > { %v549_v45 = vpack.c.bf16 %v1193_v42, %v1193_v42  ;;  %v1191_v0 = vsel %vm451_vm12, 1.0, %v1393_v39 }
  0xae   : > { %v547_v11 = vpack.c.bf16 %v1191_v0, %v1191_v0 }
  0xaf   : > { %v614_v51 = vrot.slane %v549_v45, 4  ;;  %v642_v45 = vrot.slane %v551_v27, 4 }
  0xb0   : > { %v649_v26 = vsel %vm558_vm2, %v648_v20, %v547_v11 }
  0xb1   : > { %v615_v60 = vsel %vm558_vm2, %v614_v51, %v541_v53  ;;  %v653_v40 = vperm.slane %v649_v26, %v1506_v38  ;;  %v598_v51 = vrot.slane %v597_v31, 4 }
  0xb2   : > { %v240_v61 = vpop.permute.xlu1 %239  ;;  %v1527_v1 = vpop.permute.xlu2 %258  ;;  %v619_v8 = vperm.slane %v615_v60, %v1506_v38 }
  0xb3   : > { %vm431_vm14 = vcmp.eq.s32.totalorder %v240_v61, %v1494_v32  ;;  %v227_v2 = vpop.permute.xlu0 %226  ;;  %v654_v55 = vrot.slane %v653_v40, 4  ;;  %vm434_vm4 = vcmp.eq.s32.totalorder %v1527_v1, %v1494_v32 }
  0xb4   : > { %v1171_v6 = vsel %vm431_vm14, 1.0, %v1393_v39  ;;  %vm429_vm15 = vcmp.eq.s32.totalorder %v227_v2, %v1494_v32  ;;  %v628_v24 = vrot.slane %v619_v8, 4  ;;  %v627_v54 = vsel %vm558_vm2, %v626_v48, %v619_v8 }
  0xb5   : > { %v527_v9 = vpack.c.bf16 %v1171_v6, %v1171_v6  ;;  %v1169_v14 = vsel %vm429_vm15, 1.0, %v1393_v39  ;;  %v1569_v3 = vperm.slane %v627_v54, %v1549_v35 }
  0xb6   : > { %v525_v18 = vpack.c.bf16 %v1169_v14, %v1169_v14  ;;  %v629_v44 = vsel %vm558_vm2, %v625_v30, %v628_v24 }
  0xb7   : > { %v587_v17 = vsel %vm558_vm2, %v586_v7, %v527_v9  ;;  %v637_v53 = vperm.slane %v629_v44, %v1549_v35  ;;  %v833_v21 = vshrl.u32 %v1569_v3, 16 }
  0xb8   : > { %v591_v22 = vperm.slane %v587_v17, %v1506_v38  ;;  %v559_v25 = vsel %vm558_vm2, %v557_v16, %v525_v18 }
  0xb9   : > { %v563_v29 = vperm.slane %v559_v25, %v1506_v38  ;;  %v640_v2 = vrot.slane %v637_v53, 4  ;;  %v845_v16 = vshrl.u32 %v637_v53, 16 }
  0xba   : > { %v600_v28 = vrot.slane %v591_v22, 4  ;;  %v1553_v41 = vpop.permute.xlu2 %284  ;;  %v599_v58 = vsel %vm558_vm2, %v598_v51, %v591_v22 }
  0xbb   : > { %v344_v33 = vpop.permute.xlu0 %343  ;;  %v572_v37 = vrot.slane %v563_v29, 4  ;;  %v571_v0 = vsel %vm558_vm2, %v570_v57, %v563_v29  ;;  %v1576_v8 = vperm.slane %v599_v58, %v1549_v35  ;;  %v641_v20 = vsel %vm558_vm2, 0, %v640_v2 }
  0xbc   : > { %vm447_vm0 = vcmp.eq.s32.totalorder %v344_v33, %v1494_v32  ;;  %v601_v43 = vsel %vm558_vm2, %v597_v31, %v600_v28  ;;  %v1580_v10 = vperm.slane %v571_v0, %v1549_v35  ;;  %vm438_vm5 = vcmp.eq.s32.totalorder %v1553_v41, %v1494_v32 }
  0xbd   : > { %v1187_v42 = vsel %vm447_vm0, 1.0, %v1393_v39  ;;  %v573_v47 = vsel %vm558_vm2, %v569_v34, %v572_v37  ;;  %v609_v50 = vperm.slane %v601_v43, %v1549_v35  ;;  %v786_v33 = vshrl.u32 %v1576_v8, 16 }
  0xbe   : > { %v543_v46 = vpack.c.bf16 %v1187_v42, %v1187_v42  ;;  %v581_v49 = vperm.slane %v573_v47, %v1549_v35  ;;  %v785_v31 = vshrl.u32 %v1580_v10, 16  ;;  %v851_v58 = vshrl.u32 %v641_v20, 16 }
  0xbf   : > { %v612_v63 = vrot.slane %v609_v50, 4  ;;  %v798_v7 = vshrl.u32 %v609_v50, 16 }
  0xc0   : > { %v643_v52 = vsel %vm558_vm2, %v642_v45, %v543_v46  ;;  %v584_v62 = vrot.slane %v581_v49, 4  ;;  %v797_v6 = vshrl.u32 %v581_v49, 16  ;;  %v796_v12 = vpack.i.b16 %v609_v50, %v581_v49 }
  0xc1   : > { %v647_v56 = vperm.slane %v643_v52, %v1506_v38  ;;  %v1588_v14 = vsel %vm558_vm2, 0, %v612_v63  ;;  %v787_v46 = vpack.i.b16 %v786_v33, %v785_v31 }
  0xc2   : > { %v311_v59 = vpop.permute.xlu1 %310  ;;  %v1582_v11 = vpop.permute.xlu2 %375  ;;  %v1585_v13 = vsel %vm558_vm2, 0, %v584_v62  ;;  %v799_v19 = vpack.i.b16 %v798_v7, %v797_v6  ;;  %v896_v29 = vunpack.c.l.b16 %v796_v12  ;;  %v804_v57 = vshrl.u32 %v1588_v14, 16 }
  0xc3   : > { %v655_v60 = vsel %vm558_vm2, %v654_v55, %v647_v56  ;;  %v656_v61 = vrot.slane %v647_v56, 4  ;;  %v802_v26 = vpack.i.b16 %v1588_v14, %v1585_v13  ;;  %vm442_vm1 = vcmp.eq.s32.totalorder %v311_v59, %v1494_v32 }
  0xc4   : > { %v1572_v4 = vperm.slane %v655_v60, %v1549_v35  ;;  %v1182_v45 = vsel %vm442_vm1, 1.0, %v1393_v39  ;;  %v881_v55 = vunpack.c.l.b16 %v787_v46  ;;  %v803_v56 = vshrl.u32 %v1585_v13, 16 }
  0xc5   : > { %v657_v5 = vsel %vm558_vm2, %v653_v40, %v656_v61  ;;  %v901_v40 = vunpack.c.l.b16 %v799_v19  ;;  %v906_v43 = vunpack.c.l.b16 %v802_v26  ;;  %v538_v52 = vpack.c.bf16 %v1182_v45, %v1182_v45 }
  0xc6   : > { %v665_v9 = vperm.slane %v657_v5, %v1549_v35  ;;  %v834_v22 = vshrl.u32 %v1572_v4, 16  ;;  %v1178_v59 = vsel %vm438_vm5, 1.0, %v1393_v39  ;;  %v1184_v61 = vsel %vm444_vm3, 1.0, %v1393_v39 }
  0xc7   : > { %v1174_v62 = vsel %vm434_vm4, 1.0, %v1393_v39  ;;  %v676_v63 = vrot.slane %v538_v52, 4  ;;  %v805_v5 = vpack.i.b16 %v804_v57, %v803_v56  ;;  %v534_v6 = vpack.c.bf16 %v1178_v59, %v1178_v59 }
  0xc8   : > { %v844_v15 = vpack.i.b16 %v665_v9, %v637_v53  ;;  %v846_v17 = vshrl.u32 %v665_v9, 16  ;;  %v668_v18 = vrot.slane %v665_v9, 4  ;;  %v835_v37 = vpack.i.b16 %v834_v22, %v833_v21 }
  0xc9   : > { %v540_v7 = vpack.c.bf16 %v1184_v61, %v1184_v61  ;;  %v530_v9 = vpack.c.bf16 %v1174_v62, %v1174_v62  ;;  %vm452_vm9 = vcmp.eq.s32.totalorder %v1582_v11, %v1494_v32  ;;  %v670_v19 = vrot.slane %v534_v6, 4 }
  0xca   : > { %v428_v23 = vpop.permute.xlu1 %427  ;;  %v897_v24 = vunpack.c.l.b16 %v844_v15  ;;  %v847_v25 = vpack.i.b16 %v846_v17, %v845_v16  ;;  %v669_v27 = vsel %vm558_vm2, 0, %v668_v18  ;;  %v233_v49 = vpop.permute.xlu2 %232  ;;  %v882_v50 = vunpack.c.l.b16 %v835_v37 }
  0xcb   : > { %v1596_v28 = vpop.permute.xlu0 %414  ;;  %v850_v30 = vpack.i.b16 %v669_v27, %v641_v20  ;;  %v852_v51 = vshrl.u32 %v669_v27, 16  ;;  %vm460_vm6 = vcmp.eq.s32.totalorder %v428_v23, %v1494_v32  ;;  %vm430_vm7 = vcmp.eq.s32.totalorder %v233_v49, %v1494_v32 }
  0xcc   : > { %v898_v34 = vpack.c.b16 %v897_v24, %v896_v29  ;;  %v902_v42 = vunpack.c.l.b16 %v847_v25  ;;  %v883_v41 = vpack.c.b16 %v882_v50, %v881_v55  ;;  %v1200_v0 = vsel %vm460_vm6, 1.0, %v1393_v39 }
  0xcd   : > { %v907_v44 = vunpack.c.l.b16 %v850_v30  ;;  %v853_v60 = vpack.i.b16 %v852_v51, %v851_v58  ;;  %v1170_v2 = vsel %vm430_vm7, 1.0, %v1393_v39  ;;  %v556_v12 = vpack.c.bf16 %v1200_v0, %v1200_v0 }
  0xce   : > { %899 = vrot.lane.b32.xlu0 %v898_v34, %s1395_s4  ;;  %v903_v47 = vpack.c.b16 %v902_v42, %v901_v40  ;;  %v526_v1 = vpack.c.bf16 %v1170_v2, %v1170_v2  ;;  %v784_v15 = vpack.i.b16 %v1576_v8, %v1580_v10  ;;  %v677_v16 = vsel %vm558_vm2, %v676_v63, %v530_v9 }
  0xcf   : > { %v908_v48 = vpack.c.b16 %v907_v44, %v906_v43  ;;  %v912_v36 = vunpack.c.l.b16 %v853_v60  ;;  %v911_v18 = vunpack.c.l.b16 %v805_v5  ;;  %v1192_v20 = vsel %vm452_vm9, 1.0, %v1393_v39 }
  0xd0   : > { %904 = vrot.lane.b32.xlu1 %v903_v47, %s1396_s5  ;;  %vm458_vm11 = vcmp.eq.s32.totalorder %v1596_v28, %v1494_v32  ;;  %v832_v22 = vpack.i.b16 %v1572_v4, %v1569_v3  ;;  %v704_v23 = vrot.slane %v540_v7, 4  ;;  %v1637_v24 = vperm.slane %v677_v16, %v1506_v38 }
  0xd1   : > { %909 = vrot.lane.b32.xlu2 %v908_v48, %s1397_s6  ;;  %v913_v21 = vpack.c.b16 %v912_v36, %v911_v18  ;;  %v760_v25 = vrot.slane %v556_v12, 4  ;;  %v671_v27 = vsel %vm558_vm2, %v670_v19, %v526_v1  ;;  %v1642_v30 = vunpack.c.l.b16 %v784_v15 }
  0xd2   : > { %v272_v53 = vpop.permute.xlu1 %271  ;;  %v350_v26 = vpop.permute.xlu2 %349  ;;  %v1644_v31 = vunpack.c.l.b16 %v832_v22  ;;  %v548_v33 = vpack.c.bf16 %v1192_v20, %v1192_v20  ;;  %v1198_v34 = vsel %vm458_vm11, 1.0, %v1393_v39  ;;  %v1651_v37 = vperm.slane %v671_v27, %v1506_v38 }
  0xd3   : > { %v298_v54 = vpop.permute.xlu0 %297  ;;  %vm436_vm8 = vcmp.eq.s32.totalorder %v272_v53, %v1494_v32  ;;  %vm448_vm13 = vcmp.eq.s32.totalorder %v350_v26, %v1494_v32  ;;  %v682_v43 = vrot.slane %v1637_v24, 4  ;;  %v554_v28 = vpack.c.bf16 %v1198_v34, %v1198_v34 }
  0xd4   : > { %v1176_v13 = vsel %vm436_vm8, 1.0, %v1393_v39  ;;  %vm440_vm10 = vcmp.eq.s32.totalorder %v298_v54, %v1494_v32  ;;  %v880_v42 = vpack.c.b16 %v1644_v31, %v1642_v30  ;;  %v761_v47 = vsel %vm558_vm2, %v760_v25, %v548_v33 }
  0xd5   : > { %v532_v11 = vpack.c.bf16 %v1176_v13, %v1176_v13  ;;  %v1180_v29 = vsel %vm440_vm10, 1.0, %v1393_v39  ;;  %v1188_v50 = vsel %vm448_vm13, 1.0, %v1393_v39  ;;  %v683_v52 = vsel %vm558_vm2, %v682_v43, %v1651_v37 }
  0xd6   : > { %884 = vrot.lane.b32.xlu0 %v883_v41, %s1398_s7  ;;  %v536_v44 = vpack.c.bf16 %v1180_v29, %v1180_v29  ;;  %v765_v56 = vperm.slane %v761_v47, %v1506_v38  ;;  %v732_v41 = vrot.slane %v554_v28, 4  ;;  %v544_v60 = vpack.c.bf16 %v1188_v50, %v1188_v50 }
  0xd7   : > { %v705_v40 = vsel %vm558_vm2, %v704_v23, %v532_v11  ;;  %v638_v62 = vrot.slane %v1569_v3, 4  ;;  %v689_v2 = vperm.slane %v683_v52, %v1549_v35  ;;  %v582_v13 = vrot.slane %v1580_v10, 4 }
  0xd8   : > { %v709_v49 = vperm.slane %v705_v40, %v1506_v38  ;;  %v698_v57 = vrot.slane %v536_v44, 4  ;;  %v766_v36 = vrot.slane %v765_v56, 4  ;;  %v666_v3 = vrot.slane %v1572_v4, 4 }
  0xd9   : > { %v610_v15 = vrot.slane %v1576_v8, 4  ;;  %v1684_v16 = vsel %vm558_vm2, 0, %v638_v62  ;;  %v684_v10 = vrot.slane %v1651_v37, 4  ;;  %v809_v43 = vshrl.u32 %v689_v2, 16 }
  0xda   : > { %v363_v14 = vpop.permute.xlu1 %362  ;;  %v710_v63 = vrot.slane %v709_v49, 4  ;;  %v667_v8 = vsel %vm558_vm2, 0, %v666_v3  ;;  %v839_v23 = vshrl.u32 %v1684_v16, 16  ;;  %vm960_vm3 = vcmask 64512  }
  0xdb   : > { %v389_v17 = vpop.permute.xlu0 %388  ;;  %vm450_vm12 = vcmp.eq.s32.totalorder %v363_v14, %v1494_v32  ;;  %v611_v37 = vsel %vm558_vm2, 0, %v610_v15  ;;  %v685_v40 = vsel %vm558_vm2, %v1637_v24, %v684_v10  ;;  %vm963_vm4 = vcmask 97280  }
  0xdc   : > { %v1190_v45 = vsel %vm450_vm12, 1.0, %v1393_v39  ;;  %vm454_vm14 = vcmp.eq.s32.totalorder %v389_v17, %v1494_v32  ;;  %vm966_vm5 = vcmask 130048   ;;  %vm969_vm6 = vcmask 162816  }
  0xdd   : > { %v546_v53 = vpack.c.bf16 %v1190_v45, %v1190_v45  ;;  %v1194_v58 = vsel %vm454_vm14, 1.0, %v1393_v39  ;;  %v838_v45 = vpack.i.b16 %v667_v8, %v1684_v16  ;;  %vm972_vm7 = vcmask 195584  }
  0xde   : > { %914 = vrot.lane.b32.xlu0 %v913_v21, %s1399_s8  ;;  %v550_v6 = vpack.c.bf16 %v1194_v58, %v1194_v58  ;;  %v694_v21 = vrot.slane %v689_v2, 4  ;;  %vm975_vm8 = vcmask 228352   ;;  %vm978_vm9 = vcmask 261120  }
  0xdf   : > { %v733_v5 = vsel %vm558_vm2, %v732_v41, %v546_v53  ;;  %vm981_vm10 = vcmask 293888   ;;  %vm984_vm11 = vcmask 326656   ;;  %vm987_vm12 = vcmask 359424  }
  0xe0   : > { %v737_v17 = vperm.slane %v733_v5, %v1506_v38  ;;  %v726_v4 = vrot.slane %v550_v6, 4  ;;  %v1703_v44 = vsel %vm558_vm2, 0, %v694_v21  ;;  %vm990_vm13 = vcmask 392192  }
  0xe1   : > { %vm993_vm14 = vcmask 424960  }
  0xe2   : > { %v402_v46 = vpop.permute.xlu1 %401  ;;  %v738_v29 = vrot.slane %v737_v17, 4 }
  0xe3   : > { %vm456_vm15 = vcmp.eq.s32.totalorder %v402_v46, %v1494_v32  ;;  %v246_v48 = vpop.permute.xlu0 %245 }
  0xe4   : > { %v1196_v51 = vsel %vm456_vm15, 1.0, %v1393_v39  ;;  %vm432_vm0 = vcmp.eq.s32.totalorder %v246_v48, %v1494_v32  ;;  %vm996_vm15 = vcmask 457728  }
  0xe5   : > { %v552_v54 = vpack.c.bf16 %v1196_v51, %v1196_v51  ;;  %v1172_v55 = vsel %vm432_vm0, 1.0, %v1393_v39  ;;  %vm999_vm0 = vcmask 490496  }
  0xe6   : > { %v528_v59 = vpack.c.bf16 %v1172_v55, %v1172_v55  ;;  %v840_v55 = vshrl.u32 %v667_v8, 16 }
  0xe7   : > { %v754_v61 = vrot.slane %v552_v54, 4 }
  0xe8   : > { %v699_v0 = vsel %vm558_vm2, %v698_v57, %v528_v59 }
  0xe9   : > { %v755_v7 = vsel %vm558_vm2, %v754_v61, %v544_v60  ;;  %v703_v9 = vperm.slane %v699_v0, %v1506_v38 }
  0xea   : > { %v759_v12 = vperm.slane %v755_v7, %v1506_v38  ;;  %v337_v1 = vpop.permute.xlu1 %336  ;;  %v693_v7 = vperm.slane %v685_v40, %v1549_v35 }
  0xeb   : > { %v711_v14 = vsel %vm558_vm2, %v710_v63, %v703_v9  ;;  %vm446_vm1 = vcmp.eq.s32.totalorder %v337_v1, %v1494_v32  ;;  %v712_v22 = vrot.slane %v703_v9, 4  ;;  %v1692_v32 = vsel %vm558_vm2, 0, %v582_v13 }
  0xec   : > { %v1186_v18 = vsel %vm446_vm1, 1.0, %v1393_v39  ;;  %v717_v19 = vperm.slane %v711_v14, %v1549_v35  ;;  %v767_v20 = vsel %vm558_vm2, %v766_v36, %v759_v12  ;;  %v768_v25 = vrot.slane %v759_v12, 4 }
  0xed   : > { %v542_v11 = vpack.c.bf16 %v1186_v18, %v1186_v18  ;;  %v773_v27 = vperm.slane %v767_v20, %v1549_v35  ;;  %v713_v46 = vsel %vm558_vm2, %v709_v49, %v712_v22  ;;  %v791_v6 = vshrl.u32 %v1692_v32, 16 }
  0xee   : > { %v722_v26 = vrot.slane %v717_v19, 4  ;;  %v810_v34 = vshrl.u32 %v717_v19, 16  ;;  %v808_v48 = vpack.i.b16 %v717_v19, %v689_v2  ;;  %v769_v24 = vsel %vm558_vm2, %v765_v56, %v768_v25 }
  0xef   : > { %v727_v39 = vsel %vm558_vm2, %v726_v4, %v542_v11  ;;  %v778_v51 = vrot.slane %v773_v27, 4  ;;  %v858_v54 = vshrl.u32 %v773_v27, 16  ;;  %v1720_v61 = vperm.slane %v713_v46, %v1549_v35 }
  0xf0   : > { %v731_v33 = vperm.slane %v727_v39, %v1506_v38  ;;  %v1710_v50 = vsel %vm558_vm2, 0, %v722_v26  ;;  %v811_v53 = vpack.i.b16 %v810_v34, %v809_v43  ;;  %v916_v41 = vunpack.c.l.b16 %v808_v48 }
  0xf1   : > { %v814_v60 = vpack.i.b16 %v1710_v50, %v1703_v44  ;;  %v1723_v56 = vperm.slane %v769_v24, %v1549_v35  ;;  %v779_v2 = vsel %vm558_vm2, 0, %v778_v51  ;;  %v792_v13 = vshrl.u32 %v611_v37, 16 }
  0xf2   : > { %v739_v47 = vsel %vm558_vm2, %v738_v29, %v731_v33  ;;  %v740_v28 = vrot.slane %v731_v33, 4  ;;  %v921_v12 = vunpack.c.l.b16 %v811_v53  ;;  %v822_v15 = vshrl.u32 %v1720_v61, 16 }
  0xf3   : > { %v745_v38 = vperm.slane %v739_v47, %v1549_v35  ;;  %v926_v3 = vunpack.c.l.b16 %v814_v60  ;;  %v870_v16 = vshrl.u32 %v1723_v56, 16  ;;  %v790_v18 = vpack.i.b16 %v611_v37, %v1692_v32 }
  0xf4   : > { %v741_v52 = vsel %vm558_vm2, %v737_v17, %v740_v28  ;;  %v841_v19 = vpack.i.b16 %v840_v55, %v839_v23  ;;  %v887_v4 = vunpack.c.l.b16 %v838_v45  ;;  %v793_v11 = vpack.i.b16 %v792_v13, %v791_v6 }
  0xf5   : > { %v856_v57 = vpack.i.b16 %v773_v27, %v745_v38  ;;  %v857_v58 = vshrl.u32 %v745_v38, 16  ;;  %v750_v49 = vrot.slane %v745_v38, 4  ;;  %v1715_v59 = vperm.slane %v741_v52, %v1549_v35 }
  0xf6   : > { %v821_v35 = vshrl.u32 %v693_v7, 16  ;;  %v886_v8 = vunpack.c.l.b16 %v790_v18  ;;  %v892_v25 = vunpack.c.l.b16 %v841_v19  ;;  %v816_v39 = vshrl.u32 %v1710_v50, 16 }
  0xf7   : > { %v917_v62 = vunpack.c.l.b16 %v856_v57  ;;  %v859_v63 = vpack.i.b16 %v858_v54, %v857_v58  ;;  %v751_v0 = vsel %vm558_vm2, 0, %v750_v49  ;;  %v869_v9 = vshrl.u32 %v1715_v59, 16 }
  0xf8   : > { %v862_v5 = vpack.i.b16 %v779_v2, %v751_v0  ;;  %v863_v21 = vshrl.u32 %v751_v0, 16  ;;  %v823_v22 = vpack.i.b16 %v822_v15, %v821_v35  ;;  %v864_v27 = vshrl.u32 %v779_v2, 16 }
  0xf9   : > { %v918_v36 = vpack.c.b16 %v917_v62, %v916_v41  ;;  %v922_v1 = vunpack.c.l.b16 %v859_v63  ;;  %v871_v10 = vpack.i.b16 %v870_v16, %v869_v9  ;;  %v752_v32 = vrot.slane %v1715_v59, 4 }
  0xfa   : > { %v927_v14 = vunpack.c.l.b16 %v862_v5  ;;  %v888_v23 = vpack.c.b16 %v887_v4, %v886_v8  ;;  %v891_v29 = vunpack.c.l.b16 %v793_v11  ;;  %v815_v33 = vshrl.u32 %v1703_v44, 16 }
  0xfb   : > { %919 = vrot.lane.b32.xlu1 %v918_v36, %s1400_s9  ;;  %v923_v17 = vpack.c.b16 %v922_v1, %v921_v12  ;;  %v942_v26 = vunpack.c.l.b16 %v871_v10  ;;  %v865_v34 = vpack.i.b16 %v864_v27, %v863_v21  ;;  %v941_v37 = vunpack.c.l.b16 %v823_v22  ;;  %v1226_v36 = vld [vmem:[%s1803_s1 + $0x18] sm:$0xff]  ;;  %v1225_v12 = vld [vmem:[%s1803_s1 + $0x10] sm:$0xff]  ;;  %s1332_s9 = scalar_lea.hbm %s1805_s3, 32 }
  0xfc   : > { %v928_v20 = vpack.c.b16 %v927_v14, %v926_v3  ;;  %v724_v40 = vrot.slane %v1720_v61, 4  ;;  %v780_v43 = vrot.slane %v1723_v56, 4  ;;  %v893_v45 = vpack.c.b16 %v892_v25, %v891_v29  ;;  %1045 = vmatpush.bf16.msra.mxu0 %v1226_v36  ;;  %v1224_v3 = vld [vmem:[%s1803_s1 + $0x8] sm:$0xff]  ;;  %v1223_v14 = vld [vmem:[%s1803_s1] sm:$0xff] }
  0xfd   : > { %924 = vrot.lane.b32.xlu2 %v923_v17, %s1401_s10  ;;  %v817_v46 = vpack.i.b16 %v816_v39, %v815_v33  ;;  %v868_v47 = vpack.i.b16 %v1723_v56, %v1715_v59  ;;  %v943_v28 = vpack.c.b16 %v942_v26, %v941_v37  ;;  %v820_v48 = vpack.i.b16 %v1720_v61, %v693_v7  ;;  %s197_s10 = sand.u32 1, %s1374_s13  }
  0xfe   : > { %929 = vrot.lane.b32.xlu0 %v928_v20, %s1402_s11  ;;  %v696_v38 = vrot.slane %v693_v7, 4  ;;  %v753_v44 = vsel %vm558_vm2, 0, %v752_v32  ;;  %v932_v50 = vunpack.c.l.b16 %v865_v34  ;;  %v725_v51 = vsel %vm558_vm2, 0, %v724_v40  ;;  %s1058_s5 = scalar_lea.sflag [#allocation3], %s197_s10 }
  0xff   : > { %v781_v24 = vsel %vm558_vm2, 0, %v780_v43  ;;  %v931_v52 = vunpack.c.l.b16 %v817_v46  ;;  %v937_v53 = vunpack.c.l.b16 %v868_v47  ;;  %v875_v54 = vshrl.u32 %v753_v44, 16 }
 0x100   : > { %v936_v55 = vunpack.c.l.b16 %v820_v48  ;;  %v697_v57 = vsel %vm558_vm2, 0, %v696_v38  ;;  %v874_v49 = vpack.i.b16 %v781_v24, %v753_v44  ;;  %v828_v59 = vshrl.u32 %v725_v51, 16  ;;  %1046 = vmatpush.bf16.msra.mxu0 %v1225_v12 }
 0x101   : > { %v933_v58 = vpack.c.b16 %v932_v50, %v931_v52  ;;  %v876_v41 = vshrl.u32 %v781_v24, 16  ;;  %v826_v61 = vpack.i.b16 %v725_v51, %v697_v57  ;;  %v827_v56 = vshrl.u32 %v697_v57, 16 }
 0x102   : > { %v938_v60 = vpack.c.b16 %v937_v53, %v936_v55  ;;  %v947_v63 = vunpack.c.l.b16 %v874_v49  ;;  %vm956_vm2 = vcmask 31744   ;;  %vm1038_vm1 = vcmask 523264  }
 0x103   : > { %889 = vrot.lane.b32.xlu1 %v888_v23, %s1403_s18  ;;  %v877_v62 = vpack.i.b16 %v876_v41, %v875_v54  ;;  %v829_v0 = vpack.i.b16 %v828_v59, %v827_v56  ;;  %v946_v2 = vunpack.c.l.b16 %v826_v61 }
 0x104   : > { %1047 = vmatpush.bf16.msra.mxu0 %v1224_v3 }
 0x105   : > { %894 = vrot.lane.b32.xlu2 %v893_v45, %s1404_s19  ;;  %v952_v5 = vunpack.c.l.b16 %v877_v62  ;;  %v948_v6 = vpack.c.b16 %v947_v63, %v946_v2  ;;  %v951_v7 = vunpack.c.l.b16 %v829_v0  ;;  %v1229_v45 = vld [vmem:[%s1804_s2] sm:$0xff]  }
 0x106   : > { %944 = vrot.lane.b32.xlu0 %v943_v28, %s1405_s21  ;;  %s1166_s21 = sshll.u32 %s197_s10, 4  ;;  %v1230_v46 = vunpack.c.l.bf16 %v1229_v45  ;;  %v1231_v48 = vunpack.c.h.bf16 %v1229_v45 }
 0x107   : > { %v953_v9 = vpack.c.b16 %v952_v5, %v951_v7 }
 0x108   : > { %1048 = vmatpush.bf16.msra.mxu0 %v1223_v14 }
 0x10b   : > { %934 = vrot.lane.b32.xlu1 %v933_v58, %s1406_s23  ;;  %s1227_s23 = sshll.u32 %s1382_s15, 4 }
 0x10c   : > { %s1070_s29 = scalar_lea.hbm %s1805_s3, %s1227_s23 }
 0x10d   : > { %939 = vrot.lane.b32.xlu2 %v938_v60, %s1407_s26  ;;  %s199_s26 = scalar_lea.vmem [#allocation2], %s1166_s21  ;;  %s1073_s4 = sshll.u32 %s1070_s29, 4  ;;  %s1074_s4 = int_to_ptr.hbm [resolvable:$true] %s1073_s4 }
 0x10e   : > { %s1071_s30 = sshll.u32 %s199_s26, 4  ;;  %s1326_s6 = sshra.s32 %s1074_s4, 4  ;;  %s1072_s30 = int_to_ptr.vmem [resolvable:$true] %s1071_s30  ;;  %s1327_s6 = int_to_ptr.hbm [resolvable:$true] %s1326_s6 }
 0x10f   : > { %s1328_s15 = scalar_lea.hbm %s1327_s6, 16  ;;  %p1333_p1 = scmp.lt.s32.totalorder %s1327_s6, %s1805_s3 }
 0x110   : > { %p1329_p12 = scmp.ne.s32.totalorder %s1327_s6, %s1328_s15  ;;  %p1334_p2 = scmp.lt.s32.totalorder %s1332_s9, %s1328_s15 }
 0x112   : > { %p1330_p13 = pnand %p1329_p12, %p1471_p4  ;;  %p1335_p3 = por %p1334_p2, %p1333_p1 }
 0x113   : > { %949 = vrot.lane.b32.xlu1 %v948_v6, %s1408_s27 }
 0x114   : > { %p1331_p0 = pneg %p1330_p13 }
 0x115   : > { %954 = vrot.lane.b32.xlu2 %v953_v9, %s1409_s28 }
 0x116   : > { %p1336_p5 = pnand %p1335_p3, %p1331_p0 }
 0x12b   : > { %v910_v13 = vpop.permute.xlu2 %909 }
 0x140   : > { %v900_v1 = vpop.permute.xlu0 %899 }
 0x142   : > { %v905_v15 = vpop.permute.xlu1 %904 }
 0x148   : > { %v885_v16 = vpop.permute.xlu0 %884 }
 0x149   : > { %v959_v35 = vsel %vm956_vm2, %v880_v42, %v885_v16 }
 0x150   : > { %v915_v19 = vpop.permute.xlu0 %914 }
 0x157   : > { %v925_v17 = vpop.permute.xlu2 %924 }
 0x15f   : > { %v895_v20 = vpop.permute.xlu2 %894 }
 0x167   : > { %v940_v27 = vpop.permute.xlu2 %939 }
 0x16d   : > { %v920_v18 = vpop.permute.xlu1 %919 }
 0x16f   : > { %v955_v37 = vpop.permute.xlu2 %954 }
 0x170   : > { %v930_v8 = vpop.permute.xlu0 %929 }
 0x175   : > { %v890_v10 = vpop.permute.xlu1 %889 }
 0x176   : > { %v962_v4 = vsel %vm960_vm3, %v959_v35, %v890_v10 }
 0x177   : > { %v965_v11 = vsel %vm963_vm4, %v962_v4, %v895_v20 }
 0x178   : > { %v968_v21 = vsel %vm966_vm5, %v965_v11, %v900_v1  ;;  %v945_v29 = vpop.permute.xlu0 %944 }
 0x179   : > { %v971_v22 = vsel %vm969_vm6, %v968_v21, %v905_v15 }
 0x17a   : > { %v974_v25 = vsel %vm972_vm7, %v971_v22, %v910_v13 }
 0x17b   : > { %v977_v39 = vsel %vm975_vm8, %v974_v25, %v915_v19 }
 0x17c   : > { %v980_v26 = vsel %vm978_vm9, %v977_v39, %v920_v18 }
 0x17d   : > { %v935_v30 = vpop.permute.xlu1 %934  ;;  %v983_v31 = vsel %vm981_vm10, %v980_v26, %v925_v17 }
 0x17e   : > { %v986_v42 = vsel %vm984_vm11, %v983_v31, %v930_v8 }
 0x17f   : > { %v989_v32 = vsel %vm987_vm12, %v986_v42, %v935_v30 }
 0x180   : > { %v992_v23 = vsel %vm990_vm13, %v989_v32, %v940_v27 }
 0x181   : > { %v995_v34 = vsel %vm993_vm14, %v992_v23, %v945_v29 }
 0x185   : > { %v950_v33 = vpop.permute.xlu1 %949 }
 0x186   : > { %v998_v40 = vsel %vm996_vm15, %v995_v34, %v950_v33 }
 0x187   : > { %v1001_v43 = vsel %vm999_vm0, %v998_v40, %v955_v37 }
 0x188   : > { %1217 = vmatmul.msk.bf16.vlgmr.msra.gmra.mxu0 %vm1038_vm1, %v1001_v43 }
 0x205   : > { %v1050_v47 = vpop.f32.mrf.mxu0 }
 0x206   : > { %v1051_v28 = vadd.f32 %v1230_v46, %v1050_v47 }
 0x208   : > { %1055 = vst [vmem:[%s199_s26] sm:$0xff] %v1051_v28 }
 0x20d   : > { %v1052_v38 = vpop.f32.mrf.mxu0 }
 0x20e   : > { %v1053_v44 = vadd.f32 %v1231_v48, %v1052_v38 }
 0x210   : > { %1056 = vst [vmem:[%s199_s26 + $0x8] sm:$0xff] %v1053_v44 }
 0x211   : > { %1339 = shalt.err (!%p1336_p5)
}
 0x212   : > { %s1410_s10 = smov 128  }
 0x213   : > { %1232 = dma.vmem_to_hbm [thread:$0]  (%p1471_p4), %s1072_s30, 256, %s1074_s4, %s1058_s5, %s1410_s10, %s1410_s10, %s1403_s18  }
 0x214 PF: > { %p1238_p6 = scmp.ge.s32.totalorder %s1390_s17, 2  ;;  %s1088_s21 = sand.u32 1, %s1370_s12  }
 0x215   : > { %s1089_s23 = scalar_lea.sflag [#allocation3], %s1088_s21 }
 0x216   : > { %p1235_p7 = pnand %p1238_p6, %p1478_p8 }
 0x218   : > { %p1236_p9 = pneg %p1235_p7 }
 0x21a   : > { %1365 = dma.done.wait (%p1236_p9), %s1089_s23, 256  }
 0x21b   : > { %1367 = vsyncadd (%p1236_p9), %s1089_s23, 4294967040  ;;  %s16_s17 = sadd.s32 1, %s1390_s17   ;;  %s1808_s12 = smov %s1374_s13 }
 0x21c   : > { %p13_p10 = scmp.ge.s32.totalorder %s16_s17, 4   ;;  %s1809_s13 = smov %s1378_s14 }
 0x21d   : > { %s1810_s14 = smov %s1484_s25  ;;  %s1811_s15 = smov %s1386_s16 }
 0x21e   : > { %s1812_s16 = smov %s1814_s20  ;;  %15 = sbr.rel (!%p13_p10) target bundleno = 4 (0x4), region = 70 }
 0x223   :  { %1095 = vsyncpa [#allocation3], 1 }
 0x224   :  { %1097 = vsyncpa [#allocation3 + $0x1], 1 }

// kernel: tpu_custom_call.1
= control target key start
LH: loop header
LB: loop body
LE: loop exit
PB: predicated region body
PF: predicated region fallthrough
CT: control target
= control target key end

     0   :  { %8 = vsyncpa [#allocation3], 0  ;;  %s2172_s0 = inlined_call_operand.vmem [shape: s32[32,16], index: 0, kind: input, shape index: {}]   ;;  %s2173_s1 = inlined_call_operand.vmem [shape: bf16[64,128], index: 1, kind: input, shape index: {}]   ;;  %s2174_s2 = inlined_call_operand.vmem [shape: bf16[16,128], index: 2, kind: input, shape index: {}]   ;;  %s2175_s3 = inlined_call_operand.hbm [shape: f32[32,128], index: 3, kind: output, shape index: {}]  }
   0x1   :  { %10 = vsyncpa [#allocation3 + $0x1], 0  ;;  %s1649_s12 = smov 0   ;;  %s1651_s13 = smov 0  }
   0x2   :  { %s1653_s14 = smov 0   ;;  %s1655_s15 = smov 0  }
   0x3   :  { %s1657_s16 = smov 0   ;;  %s1659_s17 = smov 0  }
   0x4 LB: > { %s1299_s18 = sadd.s32 4294967295, %s1608_s17   ;;  %s1300_s19 = sadd.s32 4294967294, %s1608_s17   ;;  %s1608_s17 = sphi %s1659_s17, %s16_s17   ;;  %s1604_s16 = sphi %s1657_s16, %s2182_s16   ;;  %s1600_s15 = sphi %s1655_s15, %s2181_s15   ;;  %s1596_s14 = sphi %s1653_s14, %s2180_s14   ;;  %s1592_s13 = sphi %s1651_s13, %s2179_s13   ;;  %s1588_s12 = sphi %s1649_s12, %s2178_s12  }
   0x5   : > { %s25_s20 = sadd.s32 1, %s1604_s16  ;;  %s112_s21 = sadd.s32 1, %s1596_s14 }
   0x6   : > { %p26_p0 = scmp.ge.s32.totalorder %s25_s20, 2  ;;  %p122_p1 = scmp.ne.s32.totalorder %s1596_s14, %s1592_s13 }
   0x7   : > { %p123_p2 = scmp.eq.s32.totalorder %s1299_s18, 1  ;;  %p128_p3 = scmp.ne.s32.totalorder %s1592_s13, %s1588_s12 }
   0x8   : > { %s2184_s20 = smov (%p26_p0, %s25_s20), 0  ;;  %p129_p5 = scmp.eq.s32.totalorder %s1300_s19, 1 }
   0x9   : > { %p1689_p4 = por %p123_p2, %p122_p1  ;;  %s109_s23 = ssub.s32 %s1604_s16, %s2184_s20 }
   0xa   : > { %p1304_p6 = scmp.ge.s32.totalorder %s1608_s17, 1  ;;  %p110_p7 = scmp.eq.s32.totalorder %s109_s23, 0 }
   0xb   : > { %p1696_p8 = por %p129_p5, %p128_p3  ;;  %p170_p9 = scmp.lt.s32.totalorder %s1608_s17, 3 }
   0xc   : > { %s1702_s25 = scalar_select %p110_p7, %s1596_s14, %s112_s21  }
   0xd   : > { %p171_p10 = pnand %p1304_p6, %p170_p9 }
   0xe   : > { %s1306_s26 = sshll.u32 (!%p171_p10), %s1600_s15, 1  ;;  %s1613_s4 = smov (!%p171_p10), 12  }
   0xf   : > { %174 = sbr.rel (%p171_p10) target bundleno = 548 (0x224), region = 32  ;;  %p202_p11 = scmp.lt.s32.totalorder (!%p171_p10), %s1306_s26, 3 }
  0x10   : > { %s1614_s5 = smov (!%p171_p10), 4   ;;  %s1615_s6 = smov (!%p171_p10), 8  }
  0x11   : > { %s1616_s7 = smov (!%p171_p10), 24   ;;  %s1617_s8 = smov (!%p171_p10), 20  }
  0x12   : > { %s1618_s9 = smov (!%p171_p10), 16   ;;  %s1619_s10 = smov (!%p171_p10), 28  }
  0x13   : > { %s1620_s11 = smov (!%p171_p10), 32   ;;  %s1621_s18 = smov (!%p171_p10), 40  }
  0x14   : > { %v219_v0 = vlaneseq  ;;  %s2186_s26 = smov (!%p202_p11, %s1306_s26), 3  ;;  %v1610_v32 = vmov 0.0   ;;  %v1611_v35 = vmov 1983009808   ;;  %vm526_vm4 = vcmask 1047556   ;;  %s1622_s19 = smov 36  }
  0x15   : > { %s1307_s27 = sshll.u32 %s2186_s26, 3  ;;  %v531_v36 = vunpack.c.l.s4 %v1611_v35  ;;  %v1612_v50 = vmov 1934713408   ;;  %s1623_s21 = smov 44  }
  0x16   : > { %v223_v1 = vshrl.u32 %v219_v0, 7  ;;  %s205_s30 = scalar_lea.vmem %s2172_s0, %s1307_s27  ;;  %v1710_v22 = vand.u32 127, %v219_v0  ;;  %v579_v51 = vunpack.c.l.s4 %v1612_v50  ;;  %s1624_s23 = smov 52  }
  0x17   : > { %v217_v2 = vld [vmem:[%s205_s30] sm:$0xff]  ;;  %v218_v8 = vld [vmem:[%s205_s30 + $0x8] sm:$0xff]  ;;  %v1726_v42 = vunpack.c.0.s8 %v531_v36  ;;  %s1625_s26 = smov 48   ;;  %s1626_s27 = smov 56  }
  0x18   : > { %1447 = vset.pattern.permute.xlu2 %v223_v1  ;;  %1446 = vset.pattern.permute.xlu1 %v223_v1  ;;  %v247_v3 = vperm.slane %v217_v2, 2  ;;  %v234_v4 = vperm.slane %v217_v2, 1  ;;  %v221_v5 = vperm.slane %v217_v2, 0  ;;  %v230_v6 = vadd.s32 8, %v223_v1  ;;  %s1627_s28 = smov 60  }
  0x19   : > { %1445 = vset.pattern.permute.xlu0 %v223_v1  ;;  %v299_v7 = vperm.slane %v217_v2, 6  ;;  %v416_v9 = vperm.slane %v218_v8, 7  ;;  %v377_v10 = vperm.slane %v218_v8, 4  ;;  %v364_v11 = vperm.slane %v218_v8, 3 }
  0x1a   : > { %v260_v12 = vperm.slane %v217_v2, 3  ;;  %v312_v13 = vperm.slane %v217_v2, 7  ;;  %v403_v14 = vperm.slane %v218_v8, 6  ;;  %v351_v15 = vperm.slane %v218_v8, 2 }
  0x1b   : > { %v338_v16 = vperm.slane %v218_v8, 1  ;;  %v286_v17 = vperm.slane %v217_v2, 5  ;;  %v273_v18 = vperm.slane %v217_v2, 4  ;;  %v325_v19 = vperm.slane %v218_v8, 0 }
  0x1c   : > { %v390_v20 = vperm.slane %v218_v8, 5  ;;  %v1750_v62 = vunpack.c.0.s8 %v579_v51 }
  0x20   : > { %252 = vperm.xlu2 %1447, %v247_v3   ;;  %239 = vperm.xlu1 %1446, %v234_v4  }
  0x21   : > { %226 = vperm.xlu0 %1445, %v221_v5  }
  0x28   : > { %1450 = vset.pattern.permute.xlu2 %v230_v6  ;;  %1448 = vset.pattern.permute.xlu1 %v230_v6 }
  0x29   : > { %304 = vperm.xlu0 %1445, %v299_v7  }
  0x30   : > { %258 = vperm.xlu2 %1450, %v247_v3   ;;  %245 = vperm.xlu1 %1448, %v234_v4  }
  0x31   : > { %421 = vperm.xlu0 %1445, %v416_v9  }
  0x38   : > { %1451 = vset.pattern.permute.xlu2 %v223_v1  ;;  %1449 = vset.pattern.permute.xlu1 %v223_v1 }
  0x39   : > { %382 = vperm.xlu0 %1445, %v377_v10  }
  0x40   : > { %369 = vperm.xlu2 %1451, %v364_v11   ;;  %265 = vperm.xlu1 %1449, %v260_v12  }
  0x41   : > { %1452 = vset.pattern.permute.xlu0 %v230_v6 }
  0x48   : > { %317 = vperm.xlu2 %1451, %v312_v13   ;;  %408 = vperm.xlu1 %1449, %v403_v14  }
  0x49   : > { %232 = vperm.xlu0 %1452, %v221_v5  }
  0x50   : > { %356 = vperm.xlu2 %1451, %v351_v15   ;;  %343 = vperm.xlu1 %1449, %v338_v16  }
  0x51   : > { %323 = vperm.xlu0 %1452, %v312_v13  }
  0x58   : > { %291 = vperm.xlu2 %1451, %v286_v17   ;;  %278 = vperm.xlu1 %1449, %v273_v18  }
  0x59   : > { %310 = vperm.xlu0 %1452, %v299_v7  }
  0x60   : > { %330 = vperm.xlu2 %1451, %v325_v19   ;;  %395 = vperm.xlu1 %1449, %v390_v20  }
  0x61   : > { %349 = vperm.xlu0 %1452, %v338_v16  }
  0x68   : > { %1454 = vset.pattern.permute.xlu2 %v230_v6  ;;  %1453 = vset.pattern.permute.xlu1 %v230_v6 }
  0x69   : > { %388 = vperm.xlu0 %1452, %v377_v10  }
  0x70   : > { %271 = vperm.xlu2 %1454, %v260_v12   ;;  %427 = vperm.xlu1 %1453, %v416_v9  }
  0x78   : > { %297 = vperm.xlu2 %1454, %v286_v17   ;;  %375 = vperm.xlu1 %1453, %v364_v11  }
  0x7a   : > { %v253_v21 = vpop.permute.xlu2 %252 }
  0x7b   : > { %vm433_vm2 = vcmp.eq.s32.totalorder %v253_v21, %v1710_v22 }
  0x7c   : > { %v1312_v33 = vsel %vm433_vm2, 1.0, %v1610_v32 }
  0x7d   : > { %v525_v37 = vrot.slane %v1312_v33, 4 }
  0x80   : > { %414 = vperm.xlu2 %1454, %v403_v14   ;;  %401 = vperm.xlu1 %1453, %v390_v20  }
  0x88   : > { %284 = vperm.xlu2 %1454, %v273_v18   ;;  %362 = vperm.xlu1 %1453, %v351_v15  }
  0x8a   : > { %v259_v23 = vpop.permute.xlu2 %258 }
  0x8b   : > { %vm434_vm0 = vcmp.eq.s32.totalorder %v259_v23, %v1710_v22 }
  0x8c   : > { %v1313_v46 = vsel %vm434_vm0, 1.0, %v1610_v32 }
  0x8d   : > { %v750_v53 = vrot.slane %v1313_v46, 4 }
  0x90   : > { %336 = vperm.xlu1 %1453, %v325_v19  }
  0x92   : > { %v240_v25 = vpop.permute.xlu1 %239 }
  0x93   : > { %v227_v24 = vpop.permute.xlu0 %226  ;;  %vm431_vm5 = vcmp.eq.s32.totalorder %v240_v25, %v1710_v22 }
  0x94   : > { %vm429_vm3 = vcmp.eq.s32.totalorder %v227_v24, %v1710_v22  ;;  %v1310_v47 = vsel %vm431_vm5, 1.0, %v1610_v32 }
  0x95   : > { %v1308_v34 = vsel %vm429_vm3, 1.0, %v1610_v32  ;;  %v540_v54 = vrot.slane %v1310_v47, 4 }
  0x96   : > { %v528_v38 = vrot.slane %v1308_v34, 4  ;;  %v527_v43 = vsel %vm526_vm4, %v525_v37, %v1308_v34 }
  0x97   : > { %v1737_v48 = vperm.slane %v527_v43, %v1726_v42 }
  0x98   : > { %v529_v44 = vsel %vm526_vm4, %v1312_v33, %v528_v38 }
  0x99   : > { %v1740_v49 = vperm.slane %v529_v44, %v1726_v42  ;;  %v576_v58 = vrot.slane %v1737_v48, 4 }
  0x9a   : > { %v370_v26 = vpop.permute.xlu2 %369 }
  0x9b   : > { %v1713_v27 = vpop.permute.xlu0 %304  ;;  %vm451_vm9 = vcmp.eq.s32.totalorder %v370_v26, %v1710_v22  ;;  %v588_v59 = vrot.slane %v1740_v49, 4 }
  0x9c   : > { %v1753_v63 = vsel %vm451_vm9, 1.0, %v1610_v32  ;;  %vm441_vm11 = vcmp.eq.s32.totalorder %v1713_v27, %v1710_v22 }
  0x9d   : > { %v650_v9 = vrot.slane %v1753_v63, 4  ;;  %v1320_v18 = vsel %vm441_vm11, 1.0, %v1610_v32 }
  0xa2   : > { %v318_v28 = vpop.permute.xlu2 %317  ;;  %v1715_v29 = vpop.permute.xlu1 %245 }
  0xa3   : > { %vm432_vm1 = vcmp.eq.s32.totalorder %v1715_v29, %v1710_v22  ;;  %v1719_v30 = vpop.permute.xlu0 %421  ;;  %vm443_vm7 = vcmp.eq.s32.totalorder %v318_v28, %v1710_v22 }
  0xa4   : > { %v1322_v55 = vsel %vm443_vm7, 1.0, %v1610_v32  ;;  %vm459_vm0 = vcmp.eq.s32.totalorder %v1719_v30, %v1710_v22  ;;  %v1311_v17 = vsel %vm432_vm1, 1.0, %v1610_v32  ;;  %v550_v30 = vrot.slane %v1320_v18, 4 }
  0xa5   : > { %v562_v1 = vrot.slane %v1322_v55, 4  ;;  %v1787_v19 = vsel %vm459_vm0, 1.0, %v1610_v32  ;;  %v764_v35 = vrot.slane %v1311_v17, 4 }
  0xa6   : > { %v674_v36 = vrot.slane %v1787_v19, 4 }
  0xaa   : > { %v357_v31 = vpop.permute.xlu2 %356 }
  0xab   : > { %v383_v39 = vpop.permute.xlu0 %382  ;;  %vm449_vm10 = vcmp.eq.s32.totalorder %v357_v31, %v1710_v22 }
  0xac   : > { %v1328_v2 = vsel %vm449_vm10, 1.0, %v1610_v32  ;;  %vm453_vm13 = vcmp.eq.s32.totalorder %v383_v39, %v1710_v22 }
  0xad   : > { %v638_v10 = vrot.slane %v1328_v2, 4  ;;  %v1332_v11 = vsel %vm453_vm13, 1.0, %v1610_v32 }
  0xae   : > { %v664_v23 = vrot.slane %v1332_v11, 4 }
  0xb2   : > { %v292_v40 = vpop.permute.xlu2 %291  ;;  %v266_v41 = vpop.permute.xlu1 %265 }
  0xb3   : > { %vm435_vm6 = vcmp.eq.s32.totalorder %v266_v41, %v1710_v22  ;;  %vm439_vm8 = vcmp.eq.s32.totalorder %v292_v40, %v1710_v22 }
  0xb4   : > { %v1314_v45 = vsel %vm435_vm6, 1.0, %v1610_v32  ;;  %v1318_v60 = vsel %vm439_vm8, 1.0, %v1610_v32 }
  0xb5   : > { %v538_v52 = vrot.slane %v1314_v45, 4  ;;  %v564_v3 = vrot.slane %v1318_v60, 4  ;;  %v541_v4 = vsel %vm526_vm4, %v1314_v45, %v540_v54  ;;  %v563_v13 = vsel %vm526_vm4, %v562_v1, %v1318_v60 }
  0xb6   : > { %v549_v14 = vperm.slane %v541_v4, %v1726_v42  ;;  %v1793_v26 = vperm.slane %v563_v13, %v1726_v42 }
  0xb7   : > { %v539_v0 = vsel %vm526_vm4, %v538_v52, %v1310_v47  ;;  %v565_v20 = vsel %vm526_vm4, %v1322_v55, %v564_v3 }
  0xb8   : > { %v545_v6 = vperm.slane %v539_v0, %v1726_v42  ;;  %v1798_v31 = vperm.slane %v565_v20, %v1726_v42  ;;  %v586_v34 = vrot.slane %v549_v14, 4  ;;  %v589_v37 = vsel %vm526_vm4, %v549_v14, %v588_v59 }
  0xb9   : > { %v598_v44 = vrot.slane %v1793_v26, 4 }
  0xba   : > { %v331_v56 = vpop.permute.xlu2 %330  ;;  %v409_v57 = vpop.permute.xlu1 %408  ;;  %v577_v25 = vsel %vm526_vm4, %v545_v6, %v576_v58  ;;  %v574_v33 = vrot.slane %v545_v6, 4  ;;  %v610_v50 = vrot.slane %v1798_v31, 4  ;;  %v587_v51 = vsel %vm526_vm4, %v586_v34, %v1740_v49 }
  0xbb   : > { %v233_v61 = vpop.permute.xlu0 %232  ;;  %vm445_vm14 = vcmp.eq.s32.totalorder %v331_v56, %v1710_v22  ;;  %vm457_vm15 = vcmp.eq.s32.totalorder %v409_v57, %v1710_v22  ;;  %v1803_v38 = vperm.slane %v577_v25, %v1750_v62 }
  0xbc   : > { %vm430_vm12 = vcmp.eq.s32.totalorder %v233_v61, %v1710_v22  ;;  %v1324_v12 = vsel %vm445_vm14, 1.0, %v1610_v32  ;;  %v1336_v15 = vsel %vm457_vm15, 1.0, %v1610_v32  ;;  %v575_v52 = vsel %vm526_vm4, %v574_v33, %v1737_v48 }
  0xbd   : > { %v1309_v5 = vsel %vm430_vm12, 1.0, %v1610_v32  ;;  %v640_v24 = vrot.slane %v1324_v12, 4  ;;  %v639_v28 = vsel %vm526_vm4, %v638_v10, %v1324_v12  ;;  %v662_v29 = vrot.slane %v1336_v15, 4 }
  0xbe   : > { %v1769_v7 = vsel %vm526_vm4, %v750_v53, %v1309_v5  ;;  %v752_v8 = vrot.slane %v1309_v5, 4  ;;  %v645_v40 = vperm.slane %v639_v28, %v1726_v42  ;;  %v665_v41 = vsel %vm526_vm4, %v1336_v15, %v664_v23 }
  0xbf   : > { %v641_v39 = vsel %vm526_vm4, %v1328_v2, %v640_v24  ;;  %v663_v45 = vsel %vm526_vm4, %v662_v29, %v1332_v11  ;;  %v1818_v53 = vperm.slane %v589_v37, %v1750_v62  ;;  %v1822_v55 = vperm.slane %v665_v41, %v1726_v42 }
  0xc0   : > { %v753_v16 = vsel %vm526_vm4, %v1313_v46, %v752_v8  ;;  %v649_v54 = vperm.slane %v641_v39, %v1726_v42  ;;  %v628_v59 = vrot.slane %v1803_v38, 4  ;;  %v688_v60 = vrot.slane %v645_v40, 4 }
  0xc1   : > { %v761_v46 = vperm.slane %v753_v16, %v1726_v42  ;;  %v1827_v49 = vperm.slane %v663_v45, %v1726_v42  ;;  %v724_v11 = vrot.slane %v1822_v55, 4  ;;  %v1854_v20 = vperm.slane %v575_v52, %v1750_v62 }
  0xc2   : > { %v344_v21 = vpop.permute.xlu1 %343  ;;  %v1861_v24 = vperm.slane %v587_v51, %v1750_v62 }
  0xc3   : > { %vm447_vm2 = vcmp.eq.s32.totalorder %v344_v21, %v1710_v22  ;;  %v324_v61 = vpop.permute.xlu0 %323  ;;  %v812_v48 = vrot.slane %v761_v46, 4  ;;  %v712_v25 = vrot.slane %v1827_v49, 4 }
  0xc4   : > { %v1326_v27 = vsel %vm447_vm2, 1.0, %v1610_v32  ;;  %vm444_vm5 = vcmp.eq.s32.totalorder %v324_v61, %v1710_v22 }
  0xc5   : > { %v651_v43 = vsel %vm526_vm4, %v650_v9, %v1326_v27  ;;  %v652_v47 = vrot.slane %v1326_v27, 4  ;;  %v1858_v23 = vsel %vm444_vm5, 1.0, %v1610_v32  ;;  %vm1103_vm5 = vcmask 130048  }
  0xc6   : > { %v657_v56 = vperm.slane %v651_v43, %v1726_v42  ;;  %v786_v37 = vrot.slane %v1858_v23, 4 }
  0xc7   : > { %v653_v0 = vsel %vm526_vm4, %v1753_v63, %v652_v47  ;;  %v1843_v63 = vperm.slane %v1769_v7, %v1726_v42 }
  0xc8   : > { %v686_v8 = vrot.slane %v657_v56, 4  ;;  %v661_v12 = vperm.slane %v653_v0, %v1726_v42  ;;  %v689_v21 = vsel %vm526_vm4, %v657_v56, %v688_v60 }
  0xca   : > { %v272_v57 = vpop.permute.xlu2 %271  ;;  %v279_v58 = vpop.permute.xlu1 %278  ;;  %v687_v28 = vsel %vm526_vm4, %v686_v8, %v645_v40  ;;  %v624_v40 = vrot.slane %v1854_v20, 4 }
  0xcb   : > { %vm436_vm1 = vcmp.eq.s32.totalorder %v272_v57, %v1710_v22  ;;  %vm437_vm3 = vcmp.eq.s32.totalorder %v279_v58, %v1710_v22  ;;  %v311_v41 = vpop.permute.xlu0 %310 }
  0xcc   : > { %v1315_v1 = vsel %vm436_vm1, 1.0, %v1610_v32  ;;  %v1316_v2 = vsel %vm437_vm3, 1.0, %v1610_v32  ;;  %vm442_vm8 = vcmp.eq.s32.totalorder %v311_v41, %v1710_v22  ;;  %vm1097_vm1 = vcmask 64512  }
  0xcd   : > { %v762_v3 = vrot.slane %v1315_v1, 4  ;;  %v765_v4 = vsel %vm526_vm4, %v1315_v1, %v764_v35  ;;  %v551_v5 = vsel %vm526_vm4, %v550_v30, %v1316_v2  ;;  %v552_v6 = vrot.slane %v1316_v2, 4 }
  0xce   : > { %v773_v9 = vperm.slane %v765_v4, %v1726_v42  ;;  %v557_v10 = vperm.slane %v551_v5, %v1726_v42  ;;  %v698_v30 = vrot.slane %v661_v12, 4  ;;  %v697_v35 = vperm.slane %v689_v21, %v1750_v62 }
  0xcf   : > { %v1847_v13 = vsel %vm526_vm4, %v762_v3, %v1311_v17  ;;  %v553_v16 = vsel %vm526_vm4, %v1320_v18, %v552_v6  ;;  %v700_v17 = vrot.slane %v649_v54, 4  ;;  %vm1100_vm3 = vcmask 97280  }
  0xd0   : > { %v810_v14 = vrot.slane %v773_v9, 4  ;;  %v1850_v15 = vsel %vm526_vm4, %v773_v9, %v812_v48  ;;  %v600_v7 = vrot.slane %v557_v10, 4  ;;  %v561_v33 = vperm.slane %v553_v16, %v1726_v42 }
  0xd1   : > { %v599_v47 = vsel %vm526_vm4, %v598_v44, %v557_v10  ;;  %v699_v58 = vsel %vm526_vm4, %v698_v30, %v649_v54  ;;  %v740_v44 = vrot.slane %v697_v35, 4  ;;  %v1896_v48 = vsel %vm442_vm8, 1.0, %v1610_v32 }
  0xd2   : > { %v1866_v29 = vsel %vm526_vm4, %v810_v14, %v761_v46  ;;  %v298_v18 = vpop.permute.xlu2 %297  ;;  %v396_v27 = vpop.permute.xlu1 %395  ;;  %v601_v34 = vsel %vm526_vm4, %v1793_v26, %v600_v7  ;;  %v1881_v46 = vperm.slane %v687_v28, %v1750_v62  ;;  %v612_v56 = vrot.slane %v561_v33, 4 }
  0xd3   : > { %vm455_vm6 = vcmp.eq.s32.totalorder %v396_v27, %v1710_v22  ;;  %vm440_vm7 = vcmp.eq.s32.totalorder %v298_v18, %v1710_v22  ;;  %v609_v52 = vperm.slane %v601_v34, %v1750_v62  ;;  %v1900_v1 = vperm.slane %v599_v47, %v1750_v62 }
  0xd4   : > { %v1334_v39 = vsel %vm455_vm6, 1.0, %v1610_v32  ;;  %v1319_v60 = vsel %vm440_vm7, 1.0, %v1610_v32  ;;  %v1909_v5 = vperm.slane %v699_v58, %v1750_v62  ;;  %v613_v10 = vsel %vm526_vm4, %v1798_v31, %v612_v56  ;;  %v1962_v56 = vpop.permute.xlu0 %349 }
  0xd5   : > { %v675_v43 = vsel %vm526_vm4, %v674_v36, %v1334_v39  ;;  %v676_v45 = vrot.slane %v1334_v39, 4  ;;  %v701_v36 = vsel %vm526_vm4, %v661_v12, %v700_v17  ;;  %v626_v3 = vrot.slane %v609_v52, 4 }
  0xd6   : > { %v681_v51 = vperm.slane %v675_v43, %v1726_v42  ;;  %v788_v6 = vrot.slane %v1319_v60, 4  ;;  %v629_v8 = vsel %vm526_vm4, %v609_v52, %v628_v59  ;;  %v787_v21 = vsel %vm526_vm4, %v786_v37, %v1319_v60 }
  0xd7   : > { %v677_v57 = vsel %vm526_vm4, %v1787_v19, %v676_v45  ;;  %v736_v19 = vrot.slane %v1881_v46, 4  ;;  %v625_v17 = vsel %vm526_vm4, %v1900_v1, %v624_v40  ;;  %v1930_v27 = vperm.slane %v613_v10, %v1750_v62 }
  0xd8   : > { %v685_v26 = vperm.slane %v677_v57, %v1726_v42  ;;  %v710_v61 = vrot.slane %v681_v51, 4  ;;  %v713_v0 = vsel %vm526_vm4, %v681_v51, %v712_v25  ;;  %v627_v25 = vsel %vm526_vm4, %v626_v3, %v1803_v38 }
  0xd9   : > { %v721_v54 = vperm.slane %v713_v0, %v1750_v62  ;;  %v611_v37 = vsel %vm526_vm4, %v610_v50, %v561_v33  ;;  %v789_v38 = vsel %vm526_vm4, %v1858_v23, %v788_v6  ;;  %v634_v39 = vrot.slane %v1930_v27, 4 }
  0xda   : > { %v1903_v2 = vpop.permute.xlu2 %414  ;;  %v711_v4 = vsel %vm526_vm4, %v710_v61, %v1827_v49  ;;  %v722_v12 = vrot.slane %v685_v26, 4  ;;  %v725_v49 = vsel %vm526_vm4, %v685_v26, %v724_v11  ;;  %v769_v11 = vperm.slane %v1847_v13, %v1726_v42 }
  0xdb   : > { %v1915_v9 = vperm.slane %v711_v4, %v1750_v62  ;;  %v741_v14 = vsel %vm526_vm4, %v721_v54, %v740_v44  ;;  %v738_v16 = vrot.slane %v721_v54, 4  ;;  %v1935_v34 = vperm.slane %v725_v49, %v1750_v62 }
  0xdc   : > { %v1465_v7 = vpack.i.bf16 %v741_v14, %v629_v8  ;;  %v723_v13 = vsel %vm526_vm4, %v722_v12, %v1822_v55  ;;  %v774_v40 = vrot.slane %v1896_v48, 4  ;;  %v1949_v31 = vperm.slane %v701_v36, %v1750_v62 }
  0xdd   : > { %v737_v59 = vsel %vm526_vm4, %v1915_v9, %v736_v19  ;;  %v739_v28 = vsel %vm526_vm4, %v738_v16, %v697_v35  ;;  %v793_v35 = vperm.slane %v787_v21, %v1726_v42  ;;  %v746_v50 = vrot.slane %v1935_v34, 4 }
  0xde   : > { %v1455_v18 = vpack.i.bf16 %v737_v59, %v625_v17  ;;  %1466 = vrot.lane.b32.xlu1 %v1465_v7, %s1613_s4  ;;  %v1460_v30 = vpack.i.bf16 %v739_v28, %v627_v25  ;;  %v729_v23 = vperm.slane %v723_v13, %v1750_v62  ;;  %v617_v43 = vperm.slane %v611_v37, %v1750_v62 }
  0xdf   : > { %v632_v45 = vrot.slane %v1861_v24, 4  ;;  %v744_v55 = vrot.slane %v1909_v5, 4  ;;  %v636_v47 = vrot.slane %v1818_v53, 4  ;;  %v798_v51 = vrot.slane %v769_v11, 4 }
  0xe0   : > { %1456 = vrot.lane.b32.xlu2 %v1455_v18, %s1614_s5  ;;  %1461 = vrot.lane.b32.xlu0 %v1460_v30, %s1615_s6  ;;  %v1960_v52 = vperm.slane %v789_v38, %v1726_v42  ;;  %v747_v57 = vsel %vm526_vm4, %v746_v50, %v1949_v31  ;;  %v822_v36 = vrot.slane %v793_v35, 4  ;;  %v635_v60 = vsel %vm526_vm4, %v634_v39, %v1818_v53  ;;  %v389_v50 = vpop.permute.xlu0 %388 }
  0xe1   : > { %v745_v26 = vsel %vm526_vm4, %v729_v23, %v744_v55  ;;  %v800_v61 = vrot.slane %v1843_v63, 4  ;;  %v1480_v19 = vpack.i.bf16 %v747_v57, %v635_v60  ;;  %v633_v3 = vsel %vm526_vm4, %v617_v43, %v632_v45 }
  0xe2   : > { %v285_v33 = vpop.permute.xlu2 %284  ;;  %v1953_v41 = vpop.permute.xlu1 %427  ;;  %v630_v4 = vrot.slane %v617_v43, 4  ;;  %v742_v6 = vrot.slane %v729_v23, 4  ;;  %v1475_v10 = vpack.i.bf16 %v745_v26, %v633_v3  ;;  %v799_v12 = vsel %vm526_vm4, %v798_v51, %v1843_v63 }
  0xe3   : > { %vm438_vm9 = vcmp.eq.s32.totalorder %v285_v33, %v1710_v22  ;;  %v801_v14 = vsel %vm526_vm4, %v769_v11, %v800_v61  ;;  %v834_v16 = vrot.slane %v1960_v52, 4  ;;  %v805_v63 = vperm.slane %v799_v12, %v1750_v62 }
  0xe4   : > { %v1317_v58 = vsel %vm438_vm9, 1.0, %v1610_v32  ;;  %v743_v59 = vsel %vm526_vm4, %v742_v6, %v1909_v5  ;;  %v748_v11 = vrot.slane %v1949_v31, 4  ;;  %v809_v30 = vperm.slane %v801_v14, %v1750_v62 }
  0xe5   : > { %v775_v44 = vsel %vm526_vm4, %v774_v40, %v1317_v58  ;;  %v776_v0 = vrot.slane %v1317_v58, 4  ;;  %v622_v37 = vrot.slane %v1900_v1, 4  ;;  %v817_v40 = vperm.slane %v1866_v29, %v1750_v62 }
  0xe6   : > { %v781_v54 = vperm.slane %v775_v44, %v1726_v42  ;;  %1481 = vrot.lane.b32.xlu1 %v1480_v19, %s1616_s7  ;;  %v852_v5 = vrot.slane %v809_v30, 4  ;;  %vm458_vm10 = vcmp.eq.s32.totalorder %v1903_v2, %v1710_v22  ;;  %v734_v31 = vrot.slane %v1915_v9, 4 }
  0xe7   : > { %v777_v8 = vsel %vm526_vm4, %v1896_v48, %v776_v0  ;;  %v631_v48 = vsel %vm526_vm4, %v630_v4, %v1861_v24  ;;  %v848_v24 = vrot.slane %v805_v63, 4  ;;  %vm460_vm11 = vcmp.eq.s32.totalorder %v1953_v41, %v1710_v22 }
  0xe8   : > { %v785_v49 = vperm.slane %v777_v8, %v1726_v42  ;;  %v823_v21 = vsel %vm526_vm4, %v822_v36, %v781_v54  ;;  %v824_v7 = vrot.slane %v781_v54, 4  ;;  %1476 = vrot.lane.b32.xlu0 %v1475_v10, %s1617_s8  ;;  %v1470_v28 = vpack.i.bf16 %v743_v59, %v631_v48 }
  0xe9   : > { %v829_v17 = vperm.slane %v823_v21, %v1750_v62  ;;  %v749_v45 = vsel %vm526_vm4, %v1935_v34, %v748_v11  ;;  %v856_v55 = vrot.slane %v817_v40, 4  ;;  %v821_v51 = vperm.slane %v1850_v15, %v1750_v62 }
  0xea   : > { %v825_v25 = vsel %vm526_vm4, %v793_v35, %v824_v7  ;;  %v376_v18 = vpop.permute.xlu1 %375  ;;  %v836_v38 = vrot.slane %v785_v49, 4  ;;  %1471 = vrot.lane.b32.xlu2 %v1470_v28, %s1618_s9  ;;  %v835_v35 = vsel %vm526_vm4, %v834_v16, %v785_v49  ;;  %vm454_vm12 = vcmp.eq.s32.totalorder %v389_v50, %v1710_v22 }
  0xeb   : > { %v846_v39 = vrot.slane %v829_v17, 4  ;;  %v833_v13 = vperm.slane %v825_v25, %v1750_v62  ;;  %v2006_v33 = vsel %vm526_vm4, %v829_v17, %v848_v24  ;;  %v841_v43 = vperm.slane %v835_v35, %v1750_v62 }
  0xec   : > { %v637_v57 = vsel %vm526_vm4, %v1930_v27, %v636_v47  ;;  %v837_v58 = vsel %vm526_vm4, %v1960_v52, %v836_v38  ;;  %v860_v26 = vrot.slane %v821_v51, 4  ;;  %v2032_v15 = vsel %vm526_vm4, %v622_v37, %v1854_v20 }
  0xed   : > { %v2001_v1 = vsel %vm526_vm4, %v846_v39, %v805_v63  ;;  %v850_v23 = vrot.slane %v833_v13, 4  ;;  %v2009_v29 = vsel %vm526_vm4, %v833_v13, %v852_v5  ;;  %v854_v36 = vrot.slane %v841_v43, 4 }
  0xee   : > { %v2027_v34 = vsel %vm526_vm4, %v841_v43, %v856_v55  ;;  %v845_v60 = vperm.slane %v837_v58, %v1750_v62  ;;  %v1339_v53 = vsel %vm460_vm11, 1.0, %v1610_v32  ;;  %v1485_v27 = vpack.i.bf16 %v749_v45, %v637_v57 }
  0xef   : > { %v2015_v9 = vsel %vm526_vm4, %v850_v23, %v809_v30  ;;  %v2039_v61 = vsel %vm526_vm4, %v854_v36, %v817_v40  ;;  %v2043_v52 = vsel %vm526_vm4, %v734_v31, %v1881_v46  ;;  %v1337_v20 = vsel %vm458_vm10, 1.0, %v1610_v32 }
  0xf0   : > { %v858_v44 = vrot.slane %v845_v60, 4  ;;  %v2051_v41 = vsel %vm526_vm4, %v845_v60, %v860_v26  ;;  %v1333_v0 = vsel %vm454_vm12, 1.0, %v1610_v32  ;;  %v898_v19 = vrot.slane %v1339_v53, 4 }
  0xf1   : > { %vm452_vm14 = vcmp.eq.s32.totalorder %v376_v18, %v1710_v22  ;;  %v886_v54 = vrot.slane %v1337_v20, 4  ;;  %v888_v4 = vrot.slane %v1333_v0, 4  ;;  %vm448_vm15 = vcmp.eq.s32.totalorder %v1962_v56, %v1710_v22 }
  0xf2   : > { %v402_v47 = vpop.permute.xlu1 %401  ;;  %1486 = vrot.lane.b32.xlu2 %v1485_v27, %s1619_s10  ;;  %v2059_v2 = vsel %vm526_vm4, %v858_v44, %v821_v51  ;;  %v1331_v8 = vsel %vm452_vm14, 1.0, %v1610_v32  ;;  %v1327_v49 = vsel %vm448_vm15, 1.0, %v1610_v32  ;;  %vm1106_vm6 = vcmask 162816   ;;  %s1550_s10 = scalar_lea.hbm %s2175_s3, 32 }
  0xf3   : > { %vm456_vm13 = vcmp.eq.s32.totalorder %v402_v47, %v1710_v22  ;;  %v887_v10 = vsel %vm526_vm4, %v886_v54, %v1333_v0  ;;  %v889_v21 = vsel %vm526_vm4, %v1337_v20, %v888_v4  ;;  %v874_v7 = vrot.slane %v1331_v8, 4 }
  0xf4   : > { %v1335_v46 = vsel %vm456_vm13, 1.0, %v1610_v32  ;;  %v893_v17 = vperm.slane %v887_v10, %v1726_v42  ;;  %v876_v56 = vrot.slane %v1327_v49, 4  ;;  %v897_v59 = vperm.slane %v889_v21, %v1726_v42 }
  0xf5   : > { %v900_v3 = vrot.slane %v1335_v46, 4  ;;  %v899_v6 = vsel %vm526_vm4, %v898_v19, %v1335_v46  ;;  %v875_v25 = vsel %vm526_vm4, %v874_v7, %v1327_v49  ;;  %vm1109_vm7 = vcmask 195584  }
  0xf6   : > { %v905_v14 = vperm.slane %v899_v6, %v1726_v42  ;;  %v877_v28 = vsel %vm526_vm4, %v1331_v8, %v876_v56  ;;  %v936_v11 = vrot.slane %v893_v17, 4  ;;  %v948_v37 = vrot.slane %v897_v59, 4 }
  0xf7   : > { %v901_v12 = vsel %vm526_vm4, %v1339_v53, %v900_v3  ;;  %v881_v38 = vperm.slane %v875_v25, %v1726_v42  ;;  %v885_v24 = vperm.slane %v877_v28, %v1726_v42  ;;  %vm1112_vm8 = vcmask 228352  }
  0xf8   : > { %v909_v48 = vperm.slane %v901_v12, %v1726_v42  ;;  %v934_v63 = vrot.slane %v905_v14, 4  ;;  %v937_v5 = vsel %vm526_vm4, %v905_v14, %v936_v11  ;;  %vm1115_vm9 = vcmask 261120  }
  0xf9   : > { %v910_v55 = vrot.slane %v881_v38, 4  ;;  %v945_v51 = vperm.slane %v937_v5, %v1750_v62  ;;  %v922_v36 = vrot.slane %v885_v24, 4  ;;  %vm1118_vm10 = vcmask 293888  }
  0xfa   : > { %v363_v16 = vpop.permute.xlu1 %362  ;;  %v946_v30 = vrot.slane %v909_v48, 4  ;;  %v935_v39 = vsel %vm526_vm4, %v934_v63, %v893_v17  ;;  %v949_v31 = vsel %vm526_vm4, %v909_v48, %v948_v37  ;;  %vm1121_vm11 = vcmask 326656  }
  0xfb   : > { %vm450_vm0 = vcmp.eq.s32.totalorder %v363_v16, %v1710_v22  ;;  %v941_v43 = vperm.slane %v935_v39, %v1750_v62  ;;  %v962_v0 = vrot.slane %v945_v51, 4  ;;  %vm1124_vm12 = vcmask 359424  }
  0xfc   : > { %v1329_v18 = vsel %vm450_vm0, 1.0, %v1610_v32  ;;  %v947_v45 = vsel %vm526_vm4, %v946_v30, %v897_v59  ;;  %vm1127_vm13 = vcmask 392192   ;;  %vm1130_vm14 = vcmask 424960  }
  0xfd   : > { %v862_v40 = vrot.slane %v1329_v18, 4  ;;  %v953_v53 = vperm.slane %v947_v45, %v1750_v62  ;;  %v958_v47 = vrot.slane %v941_v43, 4  ;;  %vm1133_vm15 = vcmask 457728  }
  0xfe   : > { %vm1136_vm0 = vcmask 490496  }
  0xff   : > { %v966_v6 = vrot.slane %v953_v53, 4 }
 0x102   : > { %v337_v13 = vpop.permute.xlu1 %336 }
 0x103   : > { %vm446_vm2 = vcmp.eq.s32.totalorder %v337_v13, %v1710_v22  ;;  %v957_v22 = vperm.slane %v949_v31, %v1750_v62  ;;  %v1363_v13 = vld [vmem:[%s2173_s1 + $0x8] sm:$0xff] }
 0x104   : > { %v1325_v35 = vsel %vm446_vm2, 1.0, %v1610_v32  ;;  %vm1176_vm2 = vcmask 523264  }
 0x105   : > { %v863_v50 = vsel %vm526_vm4, %v862_v40, %v1325_v35  ;;  %v864_v23 = vrot.slane %v1325_v35, 4  ;;  %v970_v10 = vrot.slane %v957_v22, 4 }
 0x106   : > { %v869_v57 = vperm.slane %v863_v50, %v1726_v42 }
 0x107   : > { %v865_v58 = vsel %vm526_vm4, %v1329_v18, %v864_v23 }
 0x108   : > { %v873_v32 = vperm.slane %v865_v58, %v1726_v42  ;;  %v911_v60 = vsel %vm526_vm4, %v910_v55, %v869_v57  ;;  %v912_v26 = vrot.slane %v869_v57, 4 }
 0x109   : > { %v917_v27 = vperm.slane %v911_v60, %v1750_v62 }
 0x10a   : > { %v924_v20 = vrot.slane %v873_v32, 4  ;;  %v913_v44 = vsel %vm526_vm4, %v881_v38, %v912_v26  ;;  %v923_v46 = vsel %vm526_vm4, %v922_v36, %v873_v32 }
 0x10b   : > { %v959_v19 = vsel %vm526_vm4, %v958_v47, %v917_v27  ;;  %v921_v54 = vperm.slane %v913_v44, %v1750_v62  ;;  %v960_v3 = vrot.slane %v917_v27, 4  ;;  %v929_v42 = vperm.slane %v923_v46, %v1750_v62 }
 0x10c   : > { %v1490_v4 = vpack.i.bf16 %v959_v19, %v2001_v1  ;;  %v925_v8 = vsel %vm526_vm4, %v885_v24, %v924_v20  ;;  %v1362_v24 = vld [vmem:[%s2173_s1] sm:$0xff] }
 0x10d   : > { %v963_v12 = vsel %vm526_vm4, %v962_v0, %v921_v54  ;;  %v961_v14 = vsel %vm526_vm4, %v941_v43, %v960_v3  ;;  %v964_v16 = vrot.slane %v921_v54, 4  ;;  %v968_v49 = vrot.slane %v929_v42, 4 }
 0x10e   : > { %1491 = vrot.lane.b32.xlu0 %v1490_v4, %s1620_s11  ;;  %v1500_v21 = vpack.i.bf16 %v963_v12, %v2015_v9  ;;  %v1495_v7 = vpack.i.bf16 %v961_v14, %v2006_v33  ;;  %v967_v17 = vsel %vm526_vm4, %v966_v6, %v929_v42  ;;  %v933_v1 = vperm.slane %v925_v8, %v1750_v62  ;;  %s197_s11 = sand.u32 1, %s1592_s13  }
 0x10f   : > { %v965_v48 = vsel %vm526_vm4, %v945_v51, %v964_v16  ;;  %v969_v56 = vsel %vm526_vm4, %v953_v53, %v968_v49  ;;  %v1510_v59 = vpack.i.bf16 %v967_v17, %v2039_v61  ;;  %s1197_s5 = scalar_lea.sflag [#allocation3], %s197_s11 }
 0x110   : > { %1501 = vrot.lane.b32.xlu2 %v1500_v21, %s1621_s18  ;;  %1496 = vrot.lane.b32.xlu1 %v1495_v7, %s1622_s19  ;;  %v1505_v63 = vpack.i.bf16 %v965_v48, %v2009_v29  ;;  %v1515_v9 = vpack.i.bf16 %v969_v56, %v2027_v34  ;;  %v971_v33 = vsel %vm526_vm4, %v970_v10, %v933_v1  ;;  %v972_v25 = vrot.slane %v933_v1, 4  ;;  %v1365_v34 = vld [vmem:[%s2173_s1 + $0x18] sm:$0xff] }
 0x111   : > { %v1520_v28 = vpack.i.bf16 %v971_v33, %v2059_v2  ;;  %1184 = vmatpush.bf16.msra.mxu0 %v1365_v34 }
 0x112   : > { %v973_v62 = vsel %vm526_vm4, %v957_v22, %v972_v25  ;;  %vm1094_vm4 = vcmask 31744  }
 0x113   : > { %v1525_v18 = vpack.i.bf16 %v973_v62, %v2051_v41  ;;  %v1364_v41 = vld [vmem:[%s2173_s1 + $0x10] sm:$0xff] }
 0x115   : > { %1185 = vmatpush.bf16.msra.mxu0 %v1364_v41 }
 0x116   : > { %1506 = vrot.lane.b32.xlu0 %v1505_v63, %s1623_s21  ;;  %s1305_s21 = sshll.u32 %s197_s11, 4 }
 0x118   : > { %1516 = vrot.lane.b32.xlu2 %v1515_v9, %s1624_s23  ;;  %1511 = vrot.lane.b32.xlu1 %v1510_v59, %s1625_s26  ;;  %s1366_s23 = sshll.u32 %s1600_s15, 4  ;;  %s199_s26 = scalar_lea.vmem [#allocation2], %s1305_s21 }
 0x119   : > { %1186 = vmatpush.bf16.msra.mxu0 %v1363_v13  ;;  %s1209_s29 = scalar_lea.hbm %s2175_s3, %s1366_s23  ;;  %s1210_s30 = sshll.u32 %s199_s26, 4  ;;  %s1211_s30 = int_to_ptr.vmem [resolvable:$true] %s1210_s30 }
 0x11a   : > { %s1212_s4 = sshll.u32 %s1209_s29, 4  ;;  %s1213_s4 = int_to_ptr.hbm [resolvable:$true] %s1212_s4 }
 0x11b   : > { %s1544_s7 = sshra.s32 %s1213_s4, 4  ;;  %s1545_s7 = int_to_ptr.hbm [resolvable:$true] %s1544_s7 }
 0x11c   : > { %s1546_s15 = scalar_lea.hbm %s1545_s7, 16  ;;  %p1551_p1 = scmp.lt.s32.totalorder %s1545_s7, %s2175_s3 }
 0x11d   : > { %1187 = vmatpush.bf16.msra.mxu0 %v1362_v24  ;;  %p1547_p12 = scmp.ne.s32.totalorder %s1545_s7, %s1546_s15  ;;  %p1552_p2 = scmp.lt.s32.totalorder %s1550_s10, %s1546_s15 }
 0x11e   : > { %1521 = vrot.lane.b32.xlu0 %v1520_v28, %s1626_s27 }
 0x11f   : > { %p1548_p13 = pnand %p1547_p12, %p1689_p4  ;;  %p1553_p3 = por %p1552_p2, %p1551_p1 }
 0x120   : > { %1526 = vrot.lane.b32.xlu1 %v1525_v18, %s1627_s28 }
 0x121   : > { %p1549_p0 = pneg %p1548_p13 }
 0x123   : > { %p1554_p5 = pnand %p1553_p3, %p1549_p0 }
 0x13a   : > { %v1457_v29 = vpop.permute.xlu2 %1456 }
 0x13b   : > { %v1459_v30 = vunpack.i.h.bf16 %v1457_v29  ;;  %v1458_v37 = vunpack.i.l.bf16 %v1457_v29 }
 0x13d   : > { %v1095_v5 = vsel %vm1094_vm4, %v2032_v15, %v1458_v37  ;;  %v1096_v40 = vsel %vm1094_vm4, %v2043_v52, %v1459_v30 }
 0x144   : > { %v1472_v11 = vpop.permute.xlu2 %1471 }
 0x145   : > { %v1474_v58 = vunpack.i.h.bf16 %v1472_v11  ;;  %v1473_v22 = vunpack.i.l.bf16 %v1472_v11 }
 0x14c   : > { %v1487_v32 = vpop.permute.xlu2 %1486 }
 0x14d   : > { %v1489_v19 = vunpack.i.h.bf16 %v1487_v32  ;;  %v1488_v54 = vunpack.i.l.bf16 %v1487_v32 }
 0x150   : > { %v1467_v2 = vpop.permute.xlu1 %1466 }
 0x151   : > { %v1469_v23 = vunpack.i.h.bf16 %v1467_v2  ;;  %v1468_v43 = vunpack.i.l.bf16 %v1467_v2 }
 0x152   : > { %v1462_v61 = vpop.permute.xlu0 %1461 }
 0x153   : > { %v1464_v38 = vunpack.i.h.bf16 %v1462_v61  ;;  %v1463_v39 = vunpack.i.l.bf16 %v1462_v61 }
 0x155   : > { %v1099_v35 = vsel %vm1097_vm1, %v1096_v40, %v1464_v38  ;;  %v1098_v31 = vsel %vm1097_vm1, %v1095_v5, %v1463_v39 }
 0x156   : > { %v1102_v45 = vsel %vm1100_vm3, %v1099_v35, %v1469_v23  ;;  %v1101_v55 = vsel %vm1100_vm3, %v1098_v31, %v1468_v43 }
 0x157   : > { %v1104_v15 = vsel %vm1103_vm5, %v1101_v55, %v1473_v22  ;;  %v1105_v60 = vsel %vm1103_vm5, %v1102_v45, %v1474_v58 }
 0x158   : > { %v1482_v51 = vpop.permute.xlu1 %1481 }
 0x159   : > { %v1484_v53 = vunpack.i.h.bf16 %v1482_v51  ;;  %v1483_v27 = vunpack.i.l.bf16 %v1482_v51 }
 0x15a   : > { %v1477_v50 = vpop.permute.xlu0 %1476 }
 0x15b   : > { %v1479_v57 = vunpack.i.h.bf16 %v1477_v50  ;;  %v1478_v36 = vunpack.i.l.bf16 %v1477_v50  ;;  %v1368_v50 = vld [vmem:[%s2174_s2] sm:$0xff]  }
 0x15c   : > { %v1369_v23 = vunpack.c.l.bf16 %v1368_v50  ;;  %v1370_v55 = vunpack.c.h.bf16 %v1368_v50 }
 0x15d   : > { %v1107_v52 = vsel %vm1106_vm6, %v1104_v15, %v1478_v36  ;;  %v1108_v26 = vsel %vm1106_vm6, %v1105_v60, %v1479_v57 }
 0x15e   : > { %v1110_v20 = vsel %vm1109_vm7, %v1107_v52, %v1483_v27  ;;  %v1111_v44 = vsel %vm1109_vm7, %v1108_v26, %v1484_v53 }
 0x15f   : > { %v1113_v4 = vsel %vm1112_vm8, %v1110_v20, %v1488_v54  ;;  %v1114_v6 = vsel %vm1112_vm8, %v1111_v44, %v1489_v19 }
 0x16a   : > { %v1502_v42 = vpop.permute.xlu2 %1501 }
 0x16b   : > { %v1504_v7 = vunpack.i.h.bf16 %v1502_v42  ;;  %v1503_v17 = vunpack.i.l.bf16 %v1502_v42 }
 0x172   : > { %v1517_v62 = vpop.permute.xlu2 %1516 }
 0x173   : > { %v1519_v34 = vunpack.i.h.bf16 %v1517_v62  ;;  %v1518_v61 = vunpack.i.l.bf16 %v1517_v62 }
 0x180   : > { %v1492_v47 = vpop.permute.xlu0 %1491 }
 0x181   : > { %v1494_v0 = vunpack.i.h.bf16 %v1492_v47  ;;  %v1493_v46 = vunpack.i.l.bf16 %v1492_v47 }
 0x182   : > { %v1497_v3 = vpop.permute.xlu1 %1496 }
 0x183   : > { %v1499_v8 = vunpack.i.h.bf16 %v1497_v3  ;;  %v1498_v10 = vunpack.i.l.bf16 %v1497_v3  ;;  %v1116_v12 = vsel %vm1115_vm9, %v1113_v4, %v1493_v46  ;;  %v1117_v14 = vsel %vm1115_vm9, %v1114_v6, %v1494_v0 }
 0x185   : > { %v1119_v16 = vsel %vm1118_vm10, %v1116_v12, %v1498_v10  ;;  %v1120_v49 = vsel %vm1118_vm10, %v1117_v14, %v1499_v8 }
 0x186   : > { %v1122_v59 = vsel %vm1121_vm11, %v1119_v16, %v1503_v17  ;;  %v1123_v63 = vsel %vm1121_vm11, %v1120_v49, %v1504_v7 }
 0x188   : > { %v1507_v21 = vpop.permute.xlu0 %1506 }
 0x189   : > { %v1509_v1 = vunpack.i.h.bf16 %v1507_v21  ;;  %v1508_v48 = vunpack.i.l.bf16 %v1507_v21 }
 0x18a   : > { %v1512_v56 = vpop.permute.xlu1 %1511 }
 0x18b   : > { %v1514_v9 = vunpack.i.h.bf16 %v1512_v56  ;;  %v1513_v33 = vunpack.i.l.bf16 %v1512_v56  ;;  %v1125_v25 = vsel %vm1124_vm12, %v1122_v59, %v1508_v48  ;;  %v1126_v28 = vsel %vm1124_vm12, %v1123_v63, %v1509_v1 }
 0x18d   : > { %v1128_v18 = vsel %vm1127_vm13, %v1125_v25, %v1513_v33  ;;  %v1129_v29 = vsel %vm1127_vm13, %v1126_v28, %v1514_v9 }
 0x18e   : > { %v1131_v30 = vsel %vm1130_vm14, %v1128_v18, %v1518_v61  ;;  %v1132_v37 = vsel %vm1130_vm14, %v1129_v29, %v1519_v34 }
 0x190   : > { %v1522_v41 = vpop.permute.xlu0 %1521 }
 0x191   : > { %v1524_v2 = vunpack.i.h.bf16 %v1522_v41  ;;  %v1523_v11 = vunpack.i.l.bf16 %v1522_v41 }
 0x192   : > { %v1527_v38 = vpop.permute.xlu1 %1526 }
 0x193   : > { %v1134_v39 = vsel %vm1133_vm15, %v1131_v30, %v1523_v11  ;;  %v1135_v13 = vsel %vm1133_vm15, %v1132_v37, %v1524_v2  ;;  %v1529_v24 = vunpack.i.h.bf16 %v1527_v38  ;;  %v1528_v5 = vunpack.i.l.bf16 %v1527_v38 }
 0x195   : > { %v1137_v40 = vsel %vm1136_vm0, %v1134_v39, %v1528_v5  ;;  %v1138_v35 = vsel %vm1136_vm0, %v1135_v13, %v1529_v24 }
 0x196   : > { %v1139_v31 = vpack.c.bf16 %v1138_v35, %v1137_v40 }
 0x198   : > { %1356 = vmatmul.msk.bf16.vlgmr.msra.gmra.mxu0 %vm1176_vm2, %v1139_v31 }
 0x215   : > { %v1189_v43 = vpop.f32.mrf.mxu0 }
 0x216   : > { %v1190_v45 = vadd.f32 %v1369_v23, %v1189_v43 }
 0x218   : > { %1194 = vst [vmem:[%s199_s26] sm:$0xff] %v1190_v45 }
 0x21d   : > { %v1191_v51 = vpop.f32.mrf.mxu0 }
 0x21e   : > { %v1192_v57 = vadd.f32 %v1370_v55, %v1191_v51 }
 0x220   : > { %1195 = vst [vmem:[%s199_s26 + $0x8] sm:$0xff] %v1192_v57 }
 0x221   : > { %1557 = shalt.err (!%p1554_p5)
}
 0x222   : > { %s1628_s11 = smov 128  }
 0x223   : > { %1371 = dma.vmem_to_hbm [thread:$0]  (%p1689_p4), %s1211_s30, 256, %s1213_s4, %s1197_s5, %s1628_s11, %s1628_s11, %s1615_s6  }
 0x224 PF: > { %p1377_p6 = scmp.ge.s32.totalorder %s1608_s17, 2  ;;  %s1227_s21 = sand.u32 1, %s1588_s12  }
 0x225   : > { %s1228_s23 = scalar_lea.sflag [#allocation3], %s1227_s21 }
 0x226   : > { %p1374_p7 = pnand %p1377_p6, %p1696_p8 }
 0x228   : > { %p1375_p9 = pneg %p1374_p7 }
 0x22a   : > { %1583 = dma.done.wait (%p1375_p9), %s1228_s23, 256  }
 0x22b   : > { %1585 = vsyncadd (%p1375_p9), %s1228_s23, 4294967040  ;;  %s16_s17 = sadd.s32 1, %s1608_s17   ;;  %s2178_s12 = smov %s1592_s13 }
 0x22c   : > { %p13_p10 = scmp.ge.s32.totalorder %s16_s17, 4   ;;  %s2179_s13 = smov %s1596_s14 }
 0x22d   : > { %s2180_s14 = smov %s1702_s25  ;;  %s2181_s15 = smov %s1604_s16 }
 0x22e   : > { %s2182_s16 = smov %s2184_s20  ;;  %15 = sbr.rel (!%p13_p10) target bundleno = 4 (0x4), region = 70 }
 0x233   :  { %1234 = vsyncpa [#allocation3], 1 }
 0x234   :  { %1236 = vsyncpa [#allocation3 + $0x1], 1 }

</bundles_post_ra>
